<compile_context>
chip_gen: v7x
topology: tpu7x:2x2x1
jax: 0.10.0
libtpu: 0.0.40
codegen_flags: <defaults>
</compile_context>

<pallas_src>
import functools

import jax
import jax.numpy as jnp
from jax import lax
from jax.experimental import pallas as pl
from jax.experimental.pallas import tpu as pltpu

EPS = 1e-5

IN_F = 1000    # fc1 input features
F1 = 500       # fc1 output / BN features
F2 = 50        # fc2 output features
OUT_F = 2      # fc3 output features
F1P = 512      # 500 -> 512 (4 x 128 lanes)
F2P = 128      # 50  -> 128
F3P = 128      # fc3 columns padded to 128; only first 2 are real


@functools.lru_cache(maxsize=None)
def _runtime_config():
    """Per-generation sizing. Conservative (v7x: 64 MiB VMEM/TC) by default."""
    cfg = dict(fused_max_n=1536, fused_vmem=48 << 20,
               tile_n=512, two_pass_vmem=32 << 20)
    try:
        kind = jax.devices()[0].device_kind.lower()
        if ("v4" in kind) or ("v5" in kind) or ("v6" in kind):
            # 128 MiB VMEM per TensorCore: larger fused window + bigger batch tiles.
            cfg = dict(fused_max_n=4096, fused_vmem=96 << 20,
                       tile_n=1024, two_pass_vmem=64 << 20)
    except Exception:
        pass
    return cfg


# --------------------------------------------------------------------------- #
# Fused single-kernel path (small / moderate batch: everything stays in VMEM) #
# --------------------------------------------------------------------------- #
def _fused_kernel(x_ref, w1_ref, b1_ref, gamma_ref, beta_ref,
                  w2_ref, b2_ref, w3_ref, b3_ref, o_ref):
    # fc1 + ReLU (bf16 operands on the MXU, f32 accumulate / elementwise)
    x = x_ref[...].astype(jnp.bfloat16)                               # (N, 1000)
    h1 = jnp.dot(x, w1_ref[...], preferred_element_type=jnp.float32)  # (N, 512)
    h1 = jnp.maximum(h1 + b1_ref[...], 0.0)

    # BatchNorm1d (training mode): batch mean, biased variance, single sweep.
    inv_n = 1.0 / x_ref.shape[0]
    s = jnp.sum(h1, axis=0, keepdims=True)                            # (1, 512)
    sq = jnp.sum(h1 * h1, axis=0, keepdims=True)                      # (1, 512)
    mean = s * inv_n
    var = jnp.maximum(sq * inv_n - mean * mean, 0.0)
    scale = gamma_ref[...] * lax.rsqrt(var + EPS)
    shift = beta_ref[...] - mean * scale
    h1n = h1 * scale + shift

    # fc2 + ReLU
    h2 = jnp.dot(h1n.astype(jnp.bfloat16), w2_ref[...],
                 preferred_element_type=jnp.float32)                  # (N, 128)
    h2 = jnp.maximum(h2 + b2_ref[...], 0.0)

    # fc3 + ReLU (columns padded to 128; only the first 2 are real)
    h3 = jnp.dot(h2.astype(jnp.bfloat16), w3_ref[...],
                 preferred_element_type=jnp.float32)                  # (N, 128)
    h3 = jnp.maximum(h3 + b3_ref[...], 0.0)

    # Lane-dense store; the wrapper slices the 2 real output columns.
    o_ref[...] = h3.astype(o_ref.dtype)


def _fused_forward(x, p, vmem_limit):
    n = x.shape[0]
    vmem = pl.BlockSpec(memory_space=pltpu.MemorySpace.VMEM)
    # TODO(synk): if fused_max_n is pushed further, pipeline the x HBM->VMEM load
    # with pltpu.emit_pipeline over batch chunks instead of one whole-array DMA.
    return pl.pallas_call(
        _fused_kernel,
        out_shape=jax.ShapeDtypeStruct((n, F3P), jnp.float32),
        in_specs=[vmem] * 9,
        out_specs=vmem,
        compiler_params=pltpu.CompilerParams(vmem_limit_bytes=vmem_limit),
    )(x, p["w1"], p["b1"], p["gamma"], p["beta"],
      p["w2"], p["b2"], p["w3"], p["b3"])


# --------------------------------------------------------------------------- #
# Two-pass gridded path (large batch): batch tiles are pipelined from HBM.    #
# Pass 1: fc1 + ReLU, write h1 tiles (bf16), accumulate sum / sum-of-squares. #
# Pass 2: BN normalize + fc2 + fc3, batch axis "parallel" (megacore).         #
# --------------------------------------------------------------------------- #
def _pass1_kernel(x_ref, w1_ref, b1_ref, h1_ref, sum_ref, ssq_ref, *,
                  n_rows, tile_n):
    i = pl.program_id(0)

    @pl.when(i == 0)
    def _():
        sum_ref[...] = jnp.zeros_like(sum_ref)
        ssq_ref[...] = jnp.zeros_like(ssq_ref)

    x = x_ref[...].astype(jnp.bfloat16)                               # (tile, 1000)
    h1 = jnp.dot(x, w1_ref[...], preferred_element_type=jnp.float32)  # (tile, 512)
    h1 = jnp.maximum(h1 + b1_ref[...], 0.0)

    # BN statistics accumulated in f32 from the un-rounded h1; rows past the true
    # batch size (ragged last tile) are masked out of the stats.
    row = i * tile_n + lax.broadcasted_iota(jnp.int32, (tile_n, 1), 0)
    h1m = jnp.where(row < n_rows, h1, 0.0)
    sum_ref[...] += jnp.sum(h1m, axis=0, keepdims=True)
    ssq_ref[...] += jnp.sum(h1m * h1m, axis=0, keepdims=True)

    # h1 round-trips through HBM in bf16 (it is cast to bf16 for fc2 anyway).
    h1_ref[...] = h1.astype(jnp.bfloat16)


def _pass2_kernel(h1_ref, sum_ref, ssq_ref, gamma_ref, beta_ref,
                  w2_ref, b2_ref, w3_ref, b3_ref, o_ref, *, n_rows):
    inv_n = 1.0 / n_rows
    mean = sum_ref[...] * inv_n
    var = jnp.maximum(ssq_ref[...] * inv_n - mean * mean, 0.0)
    scale = gamma_ref[...] * lax.rsqrt(var + EPS)
    shift = beta_ref[...] - mean * scale
    h1n = h1_ref[...].astype(jnp.float32) * scale + shift             # promote bf16

    h2 = jnp.dot(h1n.astype(jnp.bfloat16), w2_ref[...],
                 preferred_element_type=jnp.float32)
    h2 = jnp.maximum(h2 + b2_ref[...], 0.0)
    h3 = jnp.dot(h2.astype(jnp.bfloat16), w3_ref[...],
                 preferred_element_type=jnp.float32)
    h3 = jnp.maximum(h3 + b3_ref[...], 0.0)
    o_ref[...] = h3.astype(o_ref.dtype)                               # lane-dense


def _two_pass_forward(x, p, tile_n, vmem_limit):
    n = x.shape[0]
    assert tile_n % 16 == 0
    grid = (pl.cdiv(n, tile_n),)

    # TODO(synk): on v7x, split pass 1 over a leading "parallel" core axis with
    # per-core sum/ssq partials combined in pass 2 (modest win while HBM-bound).
    h1, ssum, ssq = pl.pallas_call(
        functools.partial(_pass1_kernel, n_rows=n, tile_n=tile_n),
        out_shape=(jax.ShapeDtypeStruct((n, F1P), jnp.bfloat16),      # bf16 h1
                   jax.ShapeDtypeStruct((1, F1P), jnp.float32),
                   jax.ShapeDtypeStruct((1, F1P), jnp.float32)),
        grid=grid,
        in_specs=[pl.BlockSpec((tile_n, IN_F), lambda i: (i, 0)),     # x tiles
                  pl.BlockSpec((IN_F, F1P), lambda i: (0, 0)),        # w1 (resident)
                  pl.BlockSpec((1, F1P), lambda i: (0, 0))],          # b1
        out_specs=(pl.BlockSpec((tile_n, F1P), lambda i: (i, 0)),     # h1 tiles
                   pl.BlockSpec((1, F1P), lambda i: (0, 0)),          # sum (accum)
                   pl.BlockSpec((1, F1P), lambda i: (0, 0))),         # sumsq (accum)
        compiler_params=pltpu.CompilerParams(
            dimension_semantics=("arbitrary",),      # accumulators -> reduction axis
            vmem_limit_bytes=vmem_limit),
    )(x, p["w1"], p["b1"])

    return pl.pallas_call(
        functools.partial(_pass2_kernel, n_rows=n),
        out_shape=jax.ShapeDtypeStruct((n, F3P), jnp.float32),
        grid=grid,
        in_specs=[pl.BlockSpec((tile_n, F1P), lambda i: (i, 0)),      # h1 tiles (bf16)
                  pl.BlockSpec((1, F1P), lambda i: (0, 0)),           # sum
                  pl.BlockSpec((1, F1P), lambda i: (0, 0)),           # sumsq
                  pl.BlockSpec((1, F1P), lambda i: (0, 0)),           # gamma
                  pl.BlockSpec((1, F1P), lambda i: (0, 0)),           # beta
                  pl.BlockSpec((F1P, F2P), lambda i: (0, 0)),         # w2
                  pl.BlockSpec((1, F2P), lambda i: (0, 0)),           # b2
                  pl.BlockSpec((F2P, F3P), lambda i: (0, 0)),         # w3
                  pl.BlockSpec((1, F3P), lambda i: (0, 0))],          # b3
        out_specs=pl.BlockSpec((tile_n, F3P), lambda i: (i, 0)),      # lane-dense out
        compiler_params=pltpu.CompilerParams(
            dimension_semantics=("parallel",),       # rows independent -> megacore
            vmem_limit_bytes=vmem_limit),
    )(h1, ssum, ssq, p["gamma"], p["beta"], p["w2"], p["b2"], p["w3"], p["b3"])


# --------------------------------------------------------------------------- #
# Wrapper / parameter preparation                                             #
# --------------------------------------------------------------------------- #
def prepare_params(params):
    """Done ONCE: transpose (out,in)->(in,out), pad to lane-dense sizes, bf16 weights."""
    w1 = jnp.pad(params["w1"].T, ((0, 0), (0, F1P - F1)))             # (1000, 512)
    b1 = jnp.pad(params["b1"], (0, F1P - F1))[None, :]
    gamma = jnp.pad(params["gamma"], (0, F1P - F1))[None, :]
    beta = jnp.pad(params["beta"], (0, F1P - F1))[None, :]
    w2 = jnp.pad(params["w2"].T, ((0, F1P - F1), (0, F2P - F2)))      # (512, 128)
    b2 = jnp.pad(params["b2"], (0, F2P - F2))[None, :]
    w3 = jnp.pad(params["w3"].T, ((0, F2P - F2), (0, F3P - OUT_F)))   # (128, 128)
    b3 = jnp.pad(params["b3"], (0, F3P - OUT_F))[None, :]
    return dict(
        w1=w1.astype(jnp.bfloat16), b1=b1.astype(jnp.float32),
        gamma=gamma.astype(jnp.float32), beta=beta.astype(jnp.float32),
        w2=w2.astype(jnp.bfloat16), b2=b2.astype(jnp.float32),
        w3=w3.astype(jnp.bfloat16), b3=b3.astype(jnp.float32),
    )


def discriminator_forward(x, prepared, *, fused_max_n=None, tile_n=None):
    """x: (N, 1000) float32. prepared: output of prepare_params() (computed once)."""
    cfg = _runtime_config()
    fused_max_n = cfg["fused_max_n"] if fused_max_n is None else fused_max_n
    tile_n = cfg["tile_n"] if tile_n is None else tile_n
    n = x.shape[0]
    if n <= fused_max_n:
        out = _fused_forward(x, prepared, cfg["fused_vmem"])
    else:
        out = _two_pass_forward(x, prepared, tile_n, cfg["two_pass_vmem"])
    return out[:, :OUT_F]                      # drop the lane-padding columns


# --------------------------------------------------------------------------- #
# Reference / test                                                            #
# --------------------------------------------------------------------------- #
def init_params(key):
    """Synthetic parameters matching the PyTorch module shapes (PyTorch layout)."""
    ks = jax.random.split(key, 5)

    def lin(k, out_f, in_f):
        bound = 1.0 / jnp.sqrt(in_f)
        kw, kb = jax.random.split(k)
        w = jax.random.uniform(kw, (out_f, in_f), jnp.float32, -bound, bound)
        b = jax.random.uniform(kb, (out_f,), jnp.float32, -bound, bound)
        return w, b

    w1, b1 = lin(ks[0], F1, IN_F)
    w2, b2 = lin(ks[1], F2, F1)
    w3, b3 = lin(ks[2], OUT_F, F2)
    # Non-trivial affine so the gamma/beta path is actually exercised.
    gamma = jax.random.uniform(ks[3], (F1,), jnp.float32, 0.5, 1.5)
    beta = 0.1 * jax.random.normal(ks[4], (F1,), jnp.float32)
    return dict(w1=w1, b1=b1, w2=w2, b2=b2, w3=w3, b3=b3, gamma=gamma, beta=beta)


def reference_forward(x, p):
    """Pure-f32 JAX reference with PyTorch training-mode BatchNorm semantics."""
    h1 = jnp.maximum(x @ p["w1"].T + p["b1"], 0.0)
    mean = jnp.mean(h1, axis=0, keepdims=True)
    var = jnp.mean((h1 - mean) ** 2, axis=0, keepdims=True)
    h1n = (h1 - mean) / jnp.sqrt(var + EPS) * p["gamma"] + p["beta"]
    h2 = jnp.maximum(h1n @ p["w2"].T + p["b2"], 0.0)
    return jnp.maximum(h2 @ p["w3"].T + p["b3"], 0.0)


if __name__ == "__main__":
    key = jax.random.PRNGKey(0)
    kp, kx1, kx2 = jax.random.split(key, 3)

    params = init_params(kp)
    prepared = prepare_params(params)   # hoisted out of the forward path

    # Small batch -> fused single-kernel path.
    x_small = jax.random.normal(kx1, (8, IN_F), jnp.float32)
    out_small = jax.block_until_ready(discriminator_forward(x_small, prepared))
    ref_small = reference_forward(x_small, params)
    assert out_small.shape == (8, OUT_F)
    assert jnp.allclose(out_small, ref_small, atol=5e-2, rtol=5e-2), (
        f"fused path: max abs diff {jnp.max(jnp.abs(out_small - ref_small))}")

    # Larger batch -> two-pass gridded path (forced; ragged last tile: 272 = 2*128 + 16).
    x_large = jax.random.normal(kx2, (272, IN_F), jnp.float32)
    out_large = jax.block_until_ready(
        discriminator_forward(x_large, prepared, fused_max_n=0, tile_n=128))
    ref_large = reference_forward(x_large, params)
    assert out_large.shape == (272, OUT_F)
    assert jnp.allclose(out_large, ref_large, atol=5e-2, rtol=5e-2), (
        f"two-pass path: max abs diff {jnp.max(jnp.abs(out_large - ref_large))}")

    print("KERNEL_OK")
</pallas_src>

<mosaic_0001>
module attributes {stable_mosaic.version = 11 : i64} {
  func.func @_fused_kernel(%arg0: memref<8x1000xf32, #tpu.memory_space<vmem>>, %arg1: memref<1000x512xbf16, #tpu.memory_space<vmem>>, %arg2: memref<1x512xf32, #tpu.memory_space<vmem>>, %arg3: memref<1x512xf32, #tpu.memory_space<vmem>>, %arg4: memref<1x512xf32, #tpu.memory_space<vmem>>, %arg5: memref<512x128xbf16, #tpu.memory_space<vmem>>, %arg6: memref<1x128xf32, #tpu.memory_space<vmem>>, %arg7: memref<128x128xbf16, #tpu.memory_space<vmem>>, %arg8: memref<1x128xf32, #tpu.memory_space<vmem>>, %arg9: memref<8x128xf32, #tpu.memory_space<vmem>>) attributes {dimension_semantics = [], scalar_prefetch = 0 : i64, scratch_operands = 0 : i64, tpu.core_type = #tpu.core_type<tc>} {
    %c0 = arith.constant 0 : index
    %c0_0 = arith.constant 0 : index
    %0 = vector.load %arg0[%c0, %c0_0] : memref<8x1000xf32, #tpu.memory_space<vmem>>, vector<8x1000xf32>
    %1 = arith.truncf %0 : vector<8x1000xf32> to vector<8x1000xbf16>
    %c0_1 = arith.constant 0 : index
    %c0_2 = arith.constant 0 : index
    %2 = vector.load %arg1[%c0_1, %c0_2] : memref<1000x512xbf16, #tpu.memory_space<vmem>>, vector<1000x512xbf16>
    %cst = arith.constant dense<0.000000e+00> : vector<8x512xf32>
    %3 = tpu.matmul %1, %2, %cst {dimension_numbers = #tpu.dot_dimension_numbers<[1], [0], [0], [1], [0, 0, 1, 1], [], []>} : vector<8x1000xbf16>, vector<1000x512xbf16>, vector<8x512xf32> -> vector<8x512xf32>
    %c0_3 = arith.constant 0 : index
    %c0_4 = arith.constant 0 : index
    %4 = vector.load %arg2[%c0_3, %c0_4] : memref<1x512xf32, #tpu.memory_space<vmem>>, vector<1x512xf32>
    %5 = vector.broadcast %4 : vector<1x512xf32> to vector<8x512xf32>
    %6 = arith.addf %3, %5 : vector<8x512xf32>
    %cst_5 = arith.constant 0.000000e+00 : f32
    %7 = vector.broadcast %cst_5 : f32 to vector<8x512xf32>
    %8 = arith.maximumf %6, %7 : vector<8x512xf32>
    %cst_6 = arith.constant dense<0.000000e+00> : vector<512xf32>
    %9 = vector.multi_reduction <add>, %8, %cst_6 [0] : vector<8x512xf32> to vector<512xf32>
    %10 = vector.shape_cast %9 : vector<512xf32> to vector<1x512xf32>
    %11 = arith.mulf %8, %8 : vector<8x512xf32>
    %cst_7 = arith.constant dense<0.000000e+00> : vector<512xf32>
    %12 = vector.multi_reduction <add>, %11, %cst_7 [0] : vector<8x512xf32> to vector<512xf32>
    %13 = vector.shape_cast %12 : vector<512xf32> to vector<1x512xf32>
    %cst_8 = arith.constant 1.250000e-01 : f32
    %14 = vector.broadcast %cst_8 : f32 to vector<1x512xf32>
    %15 = arith.mulf %10, %14 : vector<1x512xf32>
    %cst_9 = arith.constant 1.250000e-01 : f32
    %16 = vector.broadcast %cst_9 : f32 to vector<1x512xf32>
    %17 = arith.mulf %13, %16 : vector<1x512xf32>
    %18 = arith.mulf %15, %15 : vector<1x512xf32>
    %19 = arith.subf %17, %18 : vector<1x512xf32>
    %cst_10 = arith.constant 0.000000e+00 : f32
    %20 = vector.broadcast %cst_10 : f32 to vector<1x512xf32>
    %21 = arith.maximumf %19, %20 : vector<1x512xf32>
    %c0_11 = arith.constant 0 : index
    %c0_12 = arith.constant 0 : index
    %22 = vector.load %arg3[%c0_11, %c0_12] : memref<1x512xf32, #tpu.memory_space<vmem>>, vector<1x512xf32>
    %cst_13 = arith.constant 9.99999974E-6 : f32
    %23 = vector.broadcast %cst_13 : f32 to vector<1x512xf32>
    %24 = arith.addf %21, %23 : vector<1x512xf32>
    %25 = math.rsqrt %24 : vector<1x512xf32>
    %26 = arith.mulf %22, %25 : vector<1x512xf32>
    %c0_14 = arith.constant 0 : index
    %c0_15 = arith.constant 0 : index
    %27 = vector.load %arg4[%c0_14, %c0_15] : memref<1x512xf32, #tpu.memory_space<vmem>>, vector<1x512xf32>
    %28 = arith.mulf %15, %26 : vector<1x512xf32>
    %29 = arith.subf %27, %28 : vector<1x512xf32>
    %30 = vector.broadcast %26 : vector<1x512xf32> to vector<8x512xf32>
    %31 = arith.mulf %8, %30 : vector<8x512xf32>
    %32 = vector.broadcast %29 : vector<1x512xf32> to vector<8x512xf32>
    %33 = arith.addf %31, %32 : vector<8x512xf32>
    %34 = arith.truncf %33 : vector<8x512xf32> to vector<8x512xbf16>
    %c0_16 = arith.constant 0 : index
    %c0_17 = arith.constant 0 : index
    %35 = vector.load %arg5[%c0_16, %c0_17] : memref<512x128xbf16, #tpu.memory_space<vmem>>, vector<512x128xbf16>
    %cst_18 = arith.constant dense<0.000000e+00> : vector<8x128xf32>
    %36 = tpu.matmul %34, %35, %cst_18 {dimension_numbers = #tpu.dot_dimension_numbers<[1], [0], [0], [1], [0, 0, 1, 1], [], []>} : vector<8x512xbf16>, vector<512x128xbf16>, vector<8x128xf32> -> vector<8x128xf32>
    %c0_19 = arith.constant 0 : index
    %c0_20 = arith.constant 0 : index
    %37 = vector.load %arg6[%c0_19, %c0_20] : memref<1x128xf32, #tpu.memory_space<vmem>>, vector<1x128xf32>
    %38 = vector.broadcast %37 : vector<1x128xf32> to vector<8x128xf32>
    %39 = arith.addf %36, %38 : vector<8x128xf32>
    %cst_21 = arith.constant 0.000000e+00 : f32
    %40 = vector.broadcast %cst_21 : f32 to vector<8x128xf32>
    %41 = arith.maximumf %39, %40 : vector<8x128xf32>
    %42 = arith.truncf %41 : vector<8x128xf32> to vector<8x128xbf16>
    %c0_22 = arith.constant 0 : index
    %c0_23 = arith.constant 0 : index
    %43 = vector.load %arg7[%c0_22, %c0_23] : memref<128x128xbf16, #tpu.memory_space<vmem>>, vector<128x128xbf16>
    %cst_24 = arith.constant dense<0.000000e+00> : vector<8x128xf32>
    %44 = tpu.matmul %42, %43, %cst_24 {dimension_numbers = #tpu.dot_dimension_numbers<[1], [0], [0], [1], [0, 0, 1, 1], [], []>} : vector<8x128xbf16>, vector<128x128xbf16>, vector<8x128xf32> -> vector<8x128xf32>
    %c0_25 = arith.constant 0 : index
    %c0_26 = arith.constant 0 : index
    %45 = vector.load %arg8[%c0_25, %c0_26] : memref<1x128xf32, #tpu.memory_space<vmem>>, vector<1x128xf32>
    %46 = vector.broadcast %45 : vector<1x128xf32> to vector<8x128xf32>
    %47 = arith.addf %44, %46 : vector<8x128xf32>
    %cst_27 = arith.constant 0.000000e+00 : f32
    %48 = vector.broadcast %cst_27 : f32 to vector<8x128xf32>
    %49 = arith.maximumf %47, %48 : vector<8x128xf32>
    %c0_28 = arith.constant 0 : index
    %c0_29 = arith.constant 0 : index
    %50 = vector.load %arg9[%c0_28, %c0_29] : memref<8x128xf32, #tpu.memory_space<vmem>>, vector<8x128xf32>
    tpu.vector_store %arg9[%c0_28, %c0_29], %49 {strides = array<i32>} : memref<8x128xf32, #tpu.memory_space<vmem>>, vector<8x128xf32>,
    return
  }
}

</mosaic_0001>

<bundles_post_ra>
// kernel: tpu_custom_call.1
= control target key start
LH: loop header
LB: loop body
LE: loop exit
PB: predicated region body
PF: predicated region fallthrough
CT: control target
= control target key end

     0   :  { %14 = vsyncpa [#allocation3], 0  ;;  %s3805_s0 = inlined_call_operand.hbm [shape: f32[8,1000], index: 0, kind: input, shape index: {}]   ;;  %s3806_s1 = inlined_call_operand.hbm [shape: bf16[1000,512], index: 1, kind: input, shape index: {}]   ;;  %s3807_s2 = inlined_call_operand.vmem [shape: f32[1,512], index: 2, kind: input, shape index: {}]   ;;  %s3808_s3 = inlined_call_operand.vmem [shape: f32[1,512], index: 3, kind: input, shape index: {}]   ;;  %s3809_s4 = inlined_call_operand.vmem [shape: f32[1,512], index: 4, kind: input, shape index: {}]   ;;  %s3810_s5 = inlined_call_operand.hbm [shape: bf16[512,128], index: 5, kind: input, shape index: {}]   ;;  %s3811_s6 = inlined_call_operand.vmem [shape: f32[1,128], index: 6, kind: input, shape index: {}]   ;;  %s3812_s7 = inlined_call_operand.hbm [shape: bf16[128,128], index: 7, kind: input, shape index: {}]   ;;  %s3813_s8 = inlined_call_operand.vmem [shape: f32[1,128], index: 8, kind: input, shape index: {}]   ;;  %s3814_s9 = inlined_call_operand.hbm [shape: f32[8,128], index: 9, kind: output, shape index: {}]  }
   0x1   :  { %15 = vsyncpa [#allocation6], 0 }
   0x2   :  { %16 = vsyncpa [#allocation9], 0 }
   0x3   :  { %17 = vsyncpa [#allocation4], 0  ;;  %s3602_s30 = smov [#allocation5]   ;;  %s3484_s13 = scalar_lea.hbm %s3806_s1, 32000 }
   0x4   :  { %s33_s10 = sshll.u32 %s3602_s30, 4  ;;  %p3485_p0 = scmp.ne.s32.totalorder %s3806_s1, %s3484_s13  ;;  %s34_s10 = int_to_ptr.vmem [resolvable:$true] %s33_s10 }
   0x5   :  { %p3488_p1 = scmp.lt.u32.totalorder %s3484_s13, %s3806_s1 }
   0x7   :  { %p3490_p2 = pnand %p3488_p1, %p3485_p0 }
   0x9   :  { %3493 = shalt.err (!%p3490_p2)
}
   0xa   :  { %s3494_s18 = scalar_lea.vmem %s34_s10, 32000  ;;  %p3499_p4 = scmp.lt.s32.totalorder %s34_s10, %s34_s10 }
   0xb   :  { %p3495_p3 = scmp.ne.s32.totalorder %s34_s10, %s3494_s18  ;;  %p3500_p5 = scmp.lt.s32.totalorder %s3494_s18, %s3494_s18 }
   0xd   :  { %p3501_p6 = por %p3500_p5, %p3499_p4 }
   0xf   :  { %p3502_p7 = pnand %p3501_p6, %p3495_p3 }
  0x11   :  { %3505 = shalt.err (!%p3502_p7)
}
  0x12   :  { %s3603_s19 = smov 256   ;;  %s3604_s20 = smov 16  }
  0x13   :  { %39 = dma.hbm_to_vmem [thread:$0]  %s3806_s1, 32000, %s34_s10, [#allocation6], %s3603_s19, %s3603_s19, %s3604_s20  }
  0x14   :  { %s3605_s23 = smov [#allocation2]   ;;  %s3606_s25 = smov [#allocation7]  }
  0x15   :  { %s24_s24 = sshll.u32 %s3605_s23, 4  ;;  %s51_s26 = sshll.u32 %s3606_s25, 4  ;;  %s25_s24 = int_to_ptr.vmem [resolvable:$true] %s24_s24  ;;  %s52_s26 = int_to_ptr.vmem [resolvable:$true] %s51_s26 }
  0x16   :  { %s3506_s29 = scalar_lea.hbm %s3805_s0, 1024 }
  0x17   :  { %p3507_p8 = scmp.ne.s32.totalorder %s3805_s0, %s3506_s29  ;;  %p3510_p9 = scmp.lt.u32.totalorder %s3506_s29, %s3805_s0 }
  0x19   :  { %p3512_p10 = pnand %p3510_p9, %p3507_p8 }
  0x1b   :  { %3515 = shalt.err (!%p3512_p10)
}
  0x1c   :  { %s3516_s1 = scalar_lea.vmem %s25_s24, 1024  ;;  %p3521_p12 = scmp.lt.s32.totalorder %s25_s24, %s25_s24 }
  0x1d   :  { %p3517_p11 = scmp.ne.s32.totalorder %s25_s24, %s3516_s1  ;;  %p3522_p13 = scmp.lt.s32.totalorder %s3516_s1, %s3516_s1 }
  0x1f   :  { %p3523_p0 = por %p3522_p13, %p3521_p12 }
  0x21   :  { %p3524_p1 = pnand %p3523_p0, %p3517_p11 }
  0x23   :  { %3527 = shalt.err (!%p3524_p1)
}
  0x24   :  { %27 = dma.hbm_to_vmem [thread:$0]  %s3805_s0, 1024, %s25_s24, [#allocation3]  }
  0x25   :  { %s3528_s17 = scalar_lea.hbm %s3810_s5, 4096 }
  0x26   :  { %p3529_p2 = scmp.ne.s32.totalorder %s3810_s5, %s3528_s17  ;;  %p3532_p3 = scmp.lt.u32.totalorder %s3528_s17, %s3810_s5 }
  0x28   :  { %p3534_p4 = pnand %p3532_p3, %p3529_p2 }
  0x2a   :  { %3537 = shalt.err (!%p3534_p4)
}
  0x2b   :  { %s3538_s22 = scalar_lea.vmem %s52_s26, 4096  ;;  %p3543_p6 = scmp.lt.s32.totalorder %s52_s26, %s52_s26 }
  0x2c   :  { %p3539_p5 = scmp.ne.s32.totalorder %s52_s26, %s3538_s22  ;;  %p3544_p7 = scmp.lt.s32.totalorder %s3538_s22, %s3538_s22 }
  0x2e   :  { %p3545_p8 = por %p3544_p7, %p3543_p6 }
  0x30   :  { %p3546_p9 = pnand %p3545_p8, %p3539_p5 }
  0x32   :  { %3549 = shalt.err (!%p3546_p9)
}
  0x33   :  { %s3607_s0 = smov 64   ;;  %s3608_s23 = smov 4  }
  0x34   :  { %57 = dma.hbm_to_vmem [thread:$0]  %s3810_s5, 4096, %s52_s26, [#allocation6], %s3607_s0, %s3607_s0, %s3608_s23  }
  0x35   :  { %s3609_s27 = smov [#allocation8]   ;;  %s3550_s11 = scalar_lea.hbm %s3812_s7, 1024 }
  0x36   :  { %s65_s28 = sshll.u32 %s3609_s27, 4  ;;  %p3551_p10 = scmp.ne.s32.totalorder %s3812_s7, %s3550_s11  ;;  %s66_s28 = int_to_ptr.vmem [resolvable:$true] %s65_s28 }
  0x37   :  { %p3554_p11 = scmp.lt.u32.totalorder %s3550_s11, %s3812_s7 }
  0x39   :  { %p3556_p12 = pnand %p3554_p11, %p3551_p10 }
  0x3b   :  { %3559 = shalt.err (!%p3556_p12)
}
  0x3c   :  { %s3560_s14 = scalar_lea.vmem %s66_s28, 1024  ;;  %p3565_p0 = scmp.lt.s32.totalorder %s66_s28, %s66_s28 }
  0x3d   :  { %p3561_p13 = scmp.ne.s32.totalorder %s66_s28, %s3560_s14  ;;  %p3566_p1 = scmp.lt.s32.totalorder %s3560_s14, %s3560_s14 }
  0x3f   :  { %p3567_p2 = por %p3566_p1, %p3565_p0 }
  0x41   :  { %p3568_p3 = pnand %p3567_p2, %p3561_p13 }
  0x43   :  { %3571 = shalt.err (!%p3568_p3)
}
  0x44   :  { %71 = dma.hbm_to_vmem [thread:$0]  %s3812_s7, 1024, %s66_s28, [#allocation9], %s3607_s0, %s3607_s0, %s3608_s23  }
  0x45   :  { %3594 = dma.done.wait [#allocation3], 1024  }
  0x46   :  { %3595 = vsyncadd [#allocation3], 4294966272 }
  0x47   :  { %3596 = dma.done.wait [#allocation6], 36096  }
  0x48   :  { %3597 = vsyncadd [#allocation6], 4294931200 }
  0x49   :  { %3598 = dma.done.wait [#allocation9], 1024  }
  0x4a   :  { %3599 = vsyncadd [#allocation9], 4294966272  ;;  %v3060_v0 = vld [vmem:[#allocation5 + $0x4] ss:$16 sps:$4 sm:$0xff]   ;;  %v3062_v1 = vld [vmem:[#allocation5 + $0xc] ss:$16 sps:$4 sm:$0xff]  }
  0x4b   :  { %1642 = vmatprep.subr.bf16.mxu0 %v3060_v0  ;;  %v3064_v2 = vld [vmem:[#allocation5] ss:$16 sps:$4 sm:$0xff]   ;;  %v3065_v3 = vld [vmem:[#allocation5 + $0x8] ss:$16 sps:$4 sm:$0xff]   ;;  %1806 = vmatprep.subr.bf16.mxu1 %v3062_v1  ;;  %v3066_v4 = vld [vmem:[#allocation5 + $0x24] ss:$16 sps:$4 sm:$0xff]  }
  0x4c   :  { %1643 = vmatpush1.bf16.msra.mxu0 %v3064_v2  ;;  %1807 = vmatpush1.bf16.msra.mxu1 %v3065_v3  ;;  %v3068_v5 = vld [vmem:[#allocation5 + $0x2c] ss:$16 sps:$4 sm:$0xff]   ;;  %v3070_v6 = vld [vmem:[#allocation5 + $0x20] ss:$16 sps:$4 sm:$0xff]   ;;  %v3071_v7 = vld [vmem:[#allocation5 + $0x28] ss:$16 sps:$4 sm:$0xff]  }
  0x4d   :  { %1644 = vmatprep.subr.bf16.mxu0 %v3066_v4  ;;  %1808 = vmatprep.subr.bf16.mxu1 %v3068_v5  ;;  %v3072_v8 = vld [vmem:[#allocation5 + $0x44] ss:$16 sps:$4 sm:$0xff]   ;;  %v3074_v9 = vld [vmem:[#allocation5 + $0x4c] ss:$16 sps:$4 sm:$0xff]   ;;  %v3076_v10 = vld [vmem:[#allocation5 + $0x40] ss:$16 sps:$4 sm:$0xff]  }
  0x4e   :  { %v3077_v11 = vld [vmem:[#allocation5 + $0x48] ss:$16 sps:$4 sm:$0xff]   ;;  %v3078_v12 = vld [vmem:[#allocation5 + $0x64] ss:$16 sps:$4 sm:$0xff]   ;;  %v3080_v13 = vld [vmem:[#allocation5 + $0x6c] ss:$16 sps:$4 sm:$0xff]  }
  0x4f   :  { %v3082_v14 = vld [vmem:[#allocation5 + $0x60] ss:$16 sps:$4 sm:$0xff]   ;;  %v3083_v15 = vld [vmem:[#allocation5 + $0x68] ss:$16 sps:$4 sm:$0xff]   ;;  %v3084_v16 = vld [vmem:[#allocation5 + $0x84] ss:$16 sps:$4 sm:$0xff]  }
  0x50   :  { %1645 = vmatpush1.bf16.msra.mxu0 %v3070_v6  ;;  %1809 = vmatpush1.bf16.msra.mxu1 %v3071_v7  ;;  %v3086_v17 = vld [vmem:[#allocation5 + $0x8c] ss:$16 sps:$4 sm:$0xff]   ;;  %v3088_v18 = vld [vmem:[#allocation5 + $0x80] ss:$16 sps:$4 sm:$0xff]   ;;  %v3089_v19 = vld [vmem:[#allocation5 + $0x88] ss:$16 sps:$4 sm:$0xff]  }
  0x51   :  { %1646 = vmatprep.subr.bf16.mxu0 %v3072_v8  ;;  %1810 = vmatprep.subr.bf16.mxu1 %v3074_v9  ;;  %v3090_v20 = vld [vmem:[#allocation5 + $0xa4] ss:$16 sps:$4 sm:$0xff]   ;;  %v3092_v21 = vld [vmem:[#allocation5 + $0xac] ss:$16 sps:$4 sm:$0xff]   ;;  %v3094_v22 = vld [vmem:[#allocation5 + $0xa0] ss:$16 sps:$4 sm:$0xff]  }
  0x52   :  { %v3095_v23 = vld [vmem:[#allocation5 + $0xa8] ss:$16 sps:$4 sm:$0xff]   ;;  %v3096_v24 = vld [vmem:[#allocation5 + $0xc4] ss:$16 sps:$4 sm:$0xff]   ;;  %v3098_v25 = vld [vmem:[#allocation5 + $0xcc] ss:$16 sps:$4 sm:$0xff]  }
  0x53   :  { %v3100_v26 = vld [vmem:[#allocation5 + $0xc0] ss:$16 sps:$4 sm:$0xff]   ;;  %v3101_v27 = vld [vmem:[#allocation5 + $0xc8] ss:$16 sps:$4 sm:$0xff]   ;;  %v3102_v28 = vld [vmem:[#allocation5 + $0xe4] ss:$16 sps:$4 sm:$0xff]  }
  0x54   :  { %1647 = vmatpush1.bf16.msra.mxu0 %v3076_v10  ;;  %1811 = vmatpush1.bf16.msra.mxu1 %v3077_v11  ;;  %v3104_v29 = vld [vmem:[#allocation5 + $0xec] ss:$16 sps:$4 sm:$0xff]   ;;  %v3106_v30 = vld [vmem:[#allocation5 + $0xe0] ss:$16 sps:$4 sm:$0xff]   ;;  %v3107_v31 = vld [vmem:[#allocation5 + $0xe8] ss:$16 sps:$4 sm:$0xff]  }
  0x55   :  { %1648 = vmatprep.subr.bf16.mxu0 %v3078_v12  ;;  %1812 = vmatprep.subr.bf16.mxu1 %v3080_v13  ;;  %v3108_v32 = vld [vmem:[#allocation5 + $0x104] ss:$16 sps:$4 sm:$0xff]   ;;  %v3110_v33 = vld [vmem:[#allocation5 + $0x10c] ss:$16 sps:$4 sm:$0xff]   ;;  %v3112_v34 = vld [vmem:[#allocation5 + $0x100] ss:$16 sps:$4 sm:$0xff]  }
  0x56   :  { %v3113_v35 = vld [vmem:[#allocation5 + $0x108] ss:$16 sps:$4 sm:$0xff]   ;;  %v3114_v36 = vld [vmem:[#allocation5 + $0x124] ss:$16 sps:$4 sm:$0xff]   ;;  %v3116_v37 = vld [vmem:[#allocation5 + $0x12c] ss:$16 sps:$4 sm:$0xff]  }
  0x57   :  { %v3118_v38 = vld [vmem:[#allocation5 + $0x120] ss:$16 sps:$4 sm:$0xff]   ;;  %v3119_v39 = vld [vmem:[#allocation5 + $0x128] ss:$16 sps:$4 sm:$0xff]   ;;  %v3120_v40 = vld [vmem:[#allocation5 + $0x144] ss:$16 sps:$4 sm:$0xff]  }
  0x58   :  { %1649 = vmatpush1.bf16.msra.mxu0 %v3082_v14  ;;  %1813 = vmatpush1.bf16.msra.mxu1 %v3083_v15  ;;  %v3122_v41 = vld [vmem:[#allocation5 + $0x14c] ss:$16 sps:$4 sm:$0xff]   ;;  %v3124_v42 = vld [vmem:[#allocation5 + $0x140] ss:$16 sps:$4 sm:$0xff]   ;;  %v3125_v43 = vld [vmem:[#allocation5 + $0x148] ss:$16 sps:$4 sm:$0xff]  }
  0x59   :  { %1650 = vmatprep.subr.bf16.mxu0 %v3084_v16  ;;  %1814 = vmatprep.subr.bf16.mxu1 %v3086_v17  ;;  %v3126_v44 = vld [vmem:[#allocation5 + $0x164] ss:$16 sps:$4 sm:$0xff]   ;;  %v3128_v45 = vld [vmem:[#allocation5 + $0x16c] ss:$16 sps:$4 sm:$0xff]   ;;  %v3130_v47 = vld [vmem:[#allocation5 + $0x160] ss:$16 sps:$4 sm:$0xff]  }
  0x5a   :  { %v88_v46 = vld [vmem:[#allocation2 + $0x8] sm:$0xff]  ;;  %v3132_v50 = vld [vmem:[#allocation5 + $0x184] ss:$16 sps:$4 sm:$0xff]   ;;  %v3136_v52 = vld [vmem:[#allocation5 + $0x180] ss:$16 sps:$4 sm:$0xff]   ;;  %vm1625_vm0 = vcmask 850944  }
  0x5b   :  { %v96_v48 = vpack.c.bf16 %v88_v46, %v88_v46  ;;  %v3131_v49 = vld [vmem:[#allocation5 + $0x168] ss:$16 sps:$4 sm:$0xff]   ;;  %v3134_v51 = vld [vmem:[#allocation5 + $0x18c] ss:$16 sps:$4 sm:$0xff]   ;;  %v3138_v54 = vld [vmem:[#allocation5 + $0x1a4] ss:$16 sps:$4 sm:$0xff]  }
  0x5c   :  { %1651 = vmatpush1.bf16.msra.mxu0 %v3088_v18  ;;  %1815 = vmatpush1.bf16.msra.mxu1 %v3089_v19  ;;  %v3137_v53 = vld [vmem:[#allocation5 + $0x188] ss:$16 sps:$4 sm:$0xff]   ;;  %v3140_v55 = vld [vmem:[#allocation5 + $0x1ac] ss:$16 sps:$4 sm:$0xff]   ;;  %v3142_v56 = vld [vmem:[#allocation5 + $0x1a0] ss:$16 sps:$4 sm:$0xff]  }
  0x5d   :  { %1652 = vmatprep.subr.bf16.mxu0 %v3090_v20  ;;  %1816 = vmatprep.subr.bf16.mxu1 %v3092_v21  ;;  %v3143_v57 = vld [vmem:[#allocation5 + $0x1a8] ss:$16 sps:$4 sm:$0xff]   ;;  %v3144_v58 = vld [vmem:[#allocation5 + $0x1c4] ss:$16 sps:$4 sm:$0xff]   ;;  %v3146_v59 = vld [vmem:[#allocation5 + $0x1cc] ss:$16 sps:$4 sm:$0xff]  }
  0x5e   :  { %1674 = vmatprep.mubr.bf16.mxu0 %v96_v48  ;;  %1838 = vmatprep.mubr.bf16.mxu1 %v96_v48  ;;  %v3148_v60 = vld [vmem:[#allocation5 + $0x1c0] ss:$16 sps:$4 sm:$0xff]   ;;  %v3149_v61 = vld [vmem:[#allocation5 + $0x1c8] ss:$16 sps:$4 sm:$0xff]   ;;  %v3150_v62 = vld [vmem:[#allocation5 + $0x1e4] ss:$16 sps:$4 sm:$0xff]  }
  0x5f   :  { %v3152_v63 = vld [vmem:[#allocation5 + $0x1ec] ss:$16 sps:$4 sm:$0xff]   ;;  %v3154_v0 = vld [vmem:[#allocation5 + $0x1e0] ss:$16 sps:$4 sm:$0xff]   ;;  %v3155_v1 = vld [vmem:[#allocation5 + $0x1e8] ss:$16 sps:$4 sm:$0xff]  }
  0x60   :  { %1653 = vmatpush1.bf16.msra.mxu0 %v3094_v22  ;;  %1817 = vmatpush1.bf16.msra.mxu1 %v3095_v23  ;;  %v87_v2 = vld [vmem:[#allocation2] sm:$0xff]  ;;  %v3161_v4 = vld [vmem:[#allocation5 + $0x20c] ss:$16 sps:$4 sm:$0xff]   ;;  %v3159_v7 = vld [vmem:[#allocation5 + $0x208] ss:$16 sps:$4 sm:$0xff]   ;;  %vm1629_vm1 = vcmask 1043456  }
  0x61   :  { %1654 = vmatprep.subr.bf16.mxu0 %v3096_v24  ;;  %1818 = vmatprep.subr.bf16.mxu1 %v3098_v25  ;;  %v3158_v3 = vld [vmem:[#allocation5 + $0x204] ss:$16 sps:$4 sm:$0xff]   ;;  %v95_v5 = vpack.c.bf16 %v87_v2, %v87_v2  ;;  %v3156_v6 = vld [vmem:[#allocation5 + $0x200] ss:$16 sps:$4 sm:$0xff]   ;;  %v3167_v9 = vld [vmem:[#allocation5 + $0x22c] ss:$16 sps:$4 sm:$0xff]  }
  0x62   :  { %v3164_v8 = vld [vmem:[#allocation5 + $0x224] ss:$16 sps:$4 sm:$0xff]   ;;  %v3162_v10 = vld [vmem:[#allocation5 + $0x220] ss:$16 sps:$4 sm:$0xff]   ;;  %v3165_v11 = vld [vmem:[#allocation5 + $0x228] ss:$16 sps:$4 sm:$0xff]  }
  0x63   :  { %v3170_v12 = vld [vmem:[#allocation5 + $0x244] ss:$16 sps:$4 sm:$0xff]   ;;  %v3173_v13 = vld [vmem:[#allocation5 + $0x24c] ss:$16 sps:$4 sm:$0xff]   ;;  %v3168_v14 = vld [vmem:[#allocation5 + $0x240] ss:$16 sps:$4 sm:$0xff]  }
  0x64   :  { %1655 = vmatpush1.bf16.msra.mxu0 %v3100_v26  ;;  %1819 = vmatpush1.bf16.msra.mxu1 %v3101_v27  ;;  %v3171_v15 = vld [vmem:[#allocation5 + $0x248] ss:$16 sps:$4 sm:$0xff]   ;;  %v3176_v16 = vld [vmem:[#allocation5 + $0x264] ss:$16 sps:$4 sm:$0xff]   ;;  %v3179_v17 = vld [vmem:[#allocation5 + $0x26c] ss:$16 sps:$4 sm:$0xff]  }
  0x65   :  { %1656 = vmatprep.subr.bf16.mxu0 %v3102_v28  ;;  %1820 = vmatprep.subr.bf16.mxu1 %v3104_v29  ;;  %v3174_v18 = vld [vmem:[#allocation5 + $0x260] ss:$16 sps:$4 sm:$0xff]   ;;  %v3177_v19 = vld [vmem:[#allocation5 + $0x268] ss:$16 sps:$4 sm:$0xff]   ;;  %v3182_v20 = vld [vmem:[#allocation5 + $0x284] ss:$16 sps:$4 sm:$0xff]  }
  0x66   :  { %v3185_v21 = vld [vmem:[#allocation5 + $0x28c] ss:$16 sps:$4 sm:$0xff]   ;;  %v3180_v22 = vld [vmem:[#allocation5 + $0x280] ss:$16 sps:$4 sm:$0xff]   ;;  %v3183_v23 = vld [vmem:[#allocation5 + $0x288] ss:$16 sps:$4 sm:$0xff]  }
  0x67   :  { %v3188_v24 = vld [vmem:[#allocation5 + $0x2a4] ss:$16 sps:$4 sm:$0xff]   ;;  %v3191_v25 = vld [vmem:[#allocation5 + $0x2ac] ss:$16 sps:$4 sm:$0xff]   ;;  %v3186_v26 = vld [vmem:[#allocation5 + $0x2a0] ss:$16 sps:$4 sm:$0xff]  }
  0x68   :  { %1657 = vmatpush1.bf16.msra.mxu0 %v3106_v30  ;;  %1821 = vmatpush1.bf16.msra.mxu1 %v3107_v31  ;;  %v3189_v27 = vld [vmem:[#allocation5 + $0x2a8] ss:$16 sps:$4 sm:$0xff]   ;;  %v3194_v28 = vld [vmem:[#allocation5 + $0x2c4] ss:$16 sps:$4 sm:$0xff]   ;;  %v3197_v29 = vld [vmem:[#allocation5 + $0x2cc] ss:$16 sps:$4 sm:$0xff]  }
  0x69   :  { %1658 = vmatprep.subr.bf16.mxu0 %v3108_v32  ;;  %1822 = vmatprep.subr.bf16.mxu1 %v3110_v33  ;;  %v90_v30 = vld [vmem:[#allocation2 + $0x18] sm:$0xff]  ;;  %v3192_v31 = vld [vmem:[#allocation5 + $0x2c0] ss:$16 sps:$4 sm:$0xff]   ;;  %v3218_v46 = vld [vmem:[#allocation5 + $0x344] ss:$16 sps:$4 sm:$0xff]   ;;  %vm3612_vm2 = vmmov 0  }
  0x6a   :  { %v98_v32 = vpack.c.bf16 %v90_v30, %v90_v30  ;;  %v3195_v33 = vld [vmem:[#allocation5 + $0x2c8] ss:$16 sps:$4 sm:$0xff]   ;;  %v3216_v48 = vld [vmem:[#allocation5 + $0x340] ss:$16 sps:$4 sm:$0xff]   ;;  %v3248_v2 = vld [vmem:[#allocation5 + $0x3e4] ss:$16 sps:$4 sm:$0xff]  }
  0x6b   :  { %v3284_v30 = vld [vmem:[#allocation5 + $0x4a4] ss:$16 sps:$4 sm:$0xff]   ;;  %s3613_s21 = smov [#allocation10]  }
  0x6c   :  { %1659 = vmatpush1.bf16.msra.mxu0 %v3112_v34  ;;  %1823 = vmatpush1.bf16.msra.mxu1 %v3113_v35  ;;  %v3200_v34 = vld [vmem:[#allocation5 + $0x2e4] ss:$16 sps:$4 sm:$0xff]   ;;  %v3203_v35 = vld [vmem:[#allocation5 + $0x2ec] ss:$16 sps:$4 sm:$0xff]  }
  0x6d   :  { %1660 = vmatprep.subr.bf16.mxu0 %v3114_v36  ;;  %1824 = vmatprep.subr.bf16.mxu1 %v3116_v37  ;;  %v3198_v36 = vld [vmem:[#allocation5 + $0x2e0] ss:$16 sps:$4 sm:$0xff]   ;;  %v3201_v37 = vld [vmem:[#allocation5 + $0x2e8] ss:$16 sps:$4 sm:$0xff]  }
  0x70   :  { %1661 = vmatpush1.bf16.msra.mxu0 %v3118_v38  ;;  %1825 = vmatpush1.bf16.msra.mxu1 %v3119_v39  ;;  %v3206_v38 = vld [vmem:[#allocation5 + $0x304] ss:$16 sps:$4 sm:$0xff]   ;;  %v3209_v39 = vld [vmem:[#allocation5 + $0x30c] ss:$16 sps:$4 sm:$0xff]  }
  0x71   :  { %1662 = vmatprep.subr.bf16.mxu0 %v3120_v40  ;;  %1826 = vmatprep.subr.bf16.mxu1 %v3122_v41  ;;  %v3204_v40 = vld [vmem:[#allocation5 + $0x300] ss:$16 sps:$4 sm:$0xff]   ;;  %v3207_v41 = vld [vmem:[#allocation5 + $0x308] ss:$16 sps:$4 sm:$0xff]  }
  0x74   :  { %1663 = vmatpush1.bf16.msra.mxu0 %v3124_v42  ;;  %1827 = vmatpush1.bf16.msra.mxu1 %v3125_v43  ;;  %v3212_v42 = vld [vmem:[#allocation5 + $0x324] ss:$16 sps:$4 sm:$0xff]   ;;  %v3215_v43 = vld [vmem:[#allocation5 + $0x32c] ss:$16 sps:$4 sm:$0xff]  }
  0x75   :  { %1664 = vmatprep.subr.bf16.mxu0 %v3126_v44  ;;  %1828 = vmatprep.subr.bf16.mxu1 %v3128_v45  ;;  %v3210_v44 = vld [vmem:[#allocation5 + $0x320] ss:$16 sps:$4 sm:$0xff]   ;;  %v3213_v45 = vld [vmem:[#allocation5 + $0x328] ss:$16 sps:$4 sm:$0xff]  }
  0x78   :  { %1665 = vmatpush1.bf16.msra.mxu0 %v3130_v47  ;;  %1829 = vmatpush1.bf16.msra.mxu1 %v3131_v49  ;;  %v3221_v47 = vld [vmem:[#allocation5 + $0x34c] ss:$16 sps:$4 sm:$0xff]   ;;  %v3219_v49 = vld [vmem:[#allocation5 + $0x348] ss:$16 sps:$4 sm:$0xff]  }
  0x79   :  { %1666 = vmatprep.subr.bf16.mxu0 %v3132_v50  ;;  %1830 = vmatprep.subr.bf16.mxu1 %v3134_v51  ;;  %v3224_v50 = vld [vmem:[#allocation5 + $0x364] ss:$16 sps:$4 sm:$0xff]   ;;  %v3227_v51 = vld [vmem:[#allocation5 + $0x36c] ss:$16 sps:$4 sm:$0xff]  }
  0x7c   :  { %1667 = vmatpush1.bf16.msra.mxu0 %v3136_v52  ;;  %1831 = vmatpush1.bf16.msra.mxu1 %v3137_v53  ;;  %v3222_v52 = vld [vmem:[#allocation5 + $0x360] ss:$16 sps:$4 sm:$0xff]   ;;  %v3225_v53 = vld [vmem:[#allocation5 + $0x368] ss:$16 sps:$4 sm:$0xff]  }
  0x7d   :  { %1668 = vmatprep.subr.bf16.mxu0 %v3138_v54  ;;  %1832 = vmatprep.subr.bf16.mxu1 %v3140_v55  ;;  %v3230_v54 = vld [vmem:[#allocation5 + $0x384] ss:$16 sps:$4 sm:$0xff]   ;;  %v3233_v55 = vld [vmem:[#allocation5 + $0x38c] ss:$16 sps:$4 sm:$0xff]  }
  0x80   :  { %1669 = vmatpush1.bf16.msra.mxu0 %v3142_v56  ;;  %1833 = vmatpush1.bf16.msra.mxu1 %v3143_v57  ;;  %v3228_v56 = vld [vmem:[#allocation5 + $0x380] ss:$16 sps:$4 sm:$0xff]   ;;  %v3231_v57 = vld [vmem:[#allocation5 + $0x388] ss:$16 sps:$4 sm:$0xff]  }
  0x81   :  { %1670 = vmatprep.subr.bf16.mxu0 %v3144_v58  ;;  %1834 = vmatprep.subr.bf16.mxu1 %v3146_v59  ;;  %v3236_v58 = vld [vmem:[#allocation5 + $0x3a4] ss:$16 sps:$4 sm:$0xff]   ;;  %v3239_v59 = vld [vmem:[#allocation5 + $0x3ac] ss:$16 sps:$4 sm:$0xff]  }
  0x84   :  { %1671 = vmatpush1.bf16.msra.mxu0 %v3148_v60  ;;  %1835 = vmatpush1.bf16.msra.mxu1 %v3149_v61  ;;  %v3234_v60 = vld [vmem:[#allocation5 + $0x3a0] ss:$16 sps:$4 sm:$0xff]   ;;  %v3237_v61 = vld [vmem:[#allocation5 + $0x3a8] ss:$16 sps:$4 sm:$0xff]  }
  0x85   :  { %1672 = vmatprep.subr.bf16.mxu0 %v3150_v62  ;;  %1836 = vmatprep.subr.bf16.mxu1 %v3152_v63  ;;  %v3242_v62 = vld [vmem:[#allocation5 + $0x3c4] ss:$16 sps:$4 sm:$0xff]   ;;  %v3245_v63 = vld [vmem:[#allocation5 + $0x3cc] ss:$16 sps:$4 sm:$0xff]  }
  0x88   :  { %1673 = vmatpush1.bf16.msra.mxu0 %v3154_v0  ;;  %1837 = vmatpush1.bf16.msra.mxu1 %v3155_v1  ;;  %v3240_v0 = vld [vmem:[#allocation5 + $0x3c0] ss:$16 sps:$4 sm:$0xff]   ;;  %v3243_v1 = vld [vmem:[#allocation5 + $0x3c8] ss:$16 sps:$4 sm:$0xff]  }
  0x89   :  { %1683 = vmatprep.subr.bf16.mxu0 %v3158_v3  ;;  %1847 = vmatprep.subr.bf16.mxu1 %v3161_v4  ;;  %v3251_v3 = vld [vmem:[#allocation5 + $0x3ec] ss:$16 sps:$4 sm:$0xff]   ;;  %v3246_v4 = vld [vmem:[#allocation5 + $0x3e0] ss:$16 sps:$4 sm:$0xff]  }
  0x8b   :  { %1675 = vmatmul.mubr.bf16.vlgmr.msra.gmra.mrb[0].mxu0 %v95_v5  ;;  %1839 = vmatmul.mubr.bf16.vlgmr.msra.gmra.mrb[0].mxu1 %v95_v5  ;;  %v3249_v5 = vld [vmem:[#allocation5 + $0x3e8] ss:$16 sps:$4 sm:$0xff]  }
  0x8c   :  { %1684 = vmatpush1.bf16.msra.mxu0 %v3156_v6  ;;  %1848 = vmatpush1.bf16.msra.mxu1 %v3159_v7  ;;  %v3254_v6 = vld [vmem:[#allocation5 + $0x404] ss:$16 sps:$4 sm:$0xff]  }
  0x8d   :  { %1685 = vmatprep.subr.bf16.mxu0 %v3164_v8  ;;  %1849 = vmatprep.subr.bf16.mxu1 %v3167_v9  ;;  %v89_v7 = vld [vmem:[#allocation2 + $0x10] sm:$0xff]  ;;  %v3257_v8 = vld [vmem:[#allocation5 + $0x40c] ss:$16 sps:$4 sm:$0xff]  }
  0x8e   :  { %1715 = vmatprep.mubr.bf16.mxu0 %v98_v32  ;;  %1879 = vmatprep.mubr.bf16.mxu1 %v98_v32  ;;  %v3252_v9 = vld [vmem:[#allocation5 + $0x400] ss:$16 sps:$4 sm:$0xff]  }
  0x8f   :  { %v3282_v32 = vld [vmem:[#allocation5 + $0x4a0] ss:$16 sps:$4 sm:$0xff]  }
  0x90   :  { %1686 = vmatpush1.bf16.msra.mxu0 %v3162_v10  ;;  %1850 = vmatpush1.bf16.msra.mxu1 %v3165_v11  ;;  %v3255_v10 = vld [vmem:[#allocation5 + $0x408] ss:$16 sps:$4 sm:$0xff]   ;;  %v97_v11 = vpack.c.bf16 %v89_v7, %v89_v7  ;;  %v3347_v7 = vld [vmem:[#allocation5 + $0x5ec] ss:$16 sps:$4 sm:$0xff]  }
  0x91   :  { %1687 = vmatprep.subr.bf16.mxu0 %v3170_v12  ;;  %1851 = vmatprep.subr.bf16.mxu1 %v3173_v13  ;;  %v3260_v12 = vld [vmem:[#allocation5 + $0x424] ss:$16 sps:$4 sm:$0xff]   ;;  %v3263_v13 = vld [vmem:[#allocation5 + $0x42c] ss:$16 sps:$4 sm:$0xff]  }
  0x94   :  { %1688 = vmatpush1.bf16.msra.mxu0 %v3168_v14  ;;  %1852 = vmatpush1.bf16.msra.mxu1 %v3171_v15  ;;  %v92_v14 = vld [vmem:[#allocation2 + $0x28] sm:$0xff] }
  0x95   :  { %1689 = vmatprep.subr.bf16.mxu0 %v3176_v16  ;;  %1853 = vmatprep.subr.bf16.mxu1 %v3179_v17  ;;  %v100_v15 = vpack.c.bf16 %v92_v14, %v92_v14  ;;  %v3258_v16 = vld [vmem:[#allocation5 + $0x420] ss:$16 sps:$4 sm:$0xff]   ;;  %v3261_v17 = vld [vmem:[#allocation5 + $0x428] ss:$16 sps:$4 sm:$0xff]  }
  0x96   :  { %v3348_v14 = vld [vmem:[#allocation5 + $0x600] ss:$16 sps:$4 sm:$0xff]  }
  0x98   :  { %1690 = vmatpush1.bf16.msra.mxu0 %v3174_v18  ;;  %1854 = vmatpush1.bf16.msra.mxu1 %v3177_v19  ;;  %v3266_v18 = vld [vmem:[#allocation5 + $0x444] ss:$16 sps:$4 sm:$0xff]   ;;  %v3269_v19 = vld [vmem:[#allocation5 + $0x44c] ss:$16 sps:$4 sm:$0xff]  }
  0x99   :  { %1691 = vmatprep.subr.bf16.mxu0 %v3182_v20  ;;  %1855 = vmatprep.subr.bf16.mxu1 %v3185_v21  ;;  %v3264_v20 = vld [vmem:[#allocation5 + $0x440] ss:$16 sps:$4 sm:$0xff]   ;;  %v3267_v21 = vld [vmem:[#allocation5 + $0x448] ss:$16 sps:$4 sm:$0xff]  }
  0x9c   :  { %1692 = vmatpush1.bf16.msra.mxu0 %v3180_v22  ;;  %1856 = vmatpush1.bf16.msra.mxu1 %v3183_v23  ;;  %v3272_v22 = vld [vmem:[#allocation5 + $0x464] ss:$16 sps:$4 sm:$0xff]   ;;  %v3275_v23 = vld [vmem:[#allocation5 + $0x46c] ss:$16 sps:$4 sm:$0xff]  }
  0x9d   :  { %1693 = vmatprep.subr.bf16.mxu0 %v3188_v24  ;;  %1857 = vmatprep.subr.bf16.mxu1 %v3191_v25  ;;  %v3270_v24 = vld [vmem:[#allocation5 + $0x460] ss:$16 sps:$4 sm:$0xff]   ;;  %v3273_v25 = vld [vmem:[#allocation5 + $0x468] ss:$16 sps:$4 sm:$0xff]  }
  0xa0   :  { %1694 = vmatpush1.bf16.msra.mxu0 %v3186_v26  ;;  %1858 = vmatpush1.bf16.msra.mxu1 %v3189_v27  ;;  %v3278_v26 = vld [vmem:[#allocation5 + $0x484] ss:$16 sps:$4 sm:$0xff]   ;;  %v3281_v27 = vld [vmem:[#allocation5 + $0x48c] ss:$16 sps:$4 sm:$0xff]  }
  0xa1   :  { %1695 = vmatprep.subr.bf16.mxu0 %v3194_v28  ;;  %1859 = vmatprep.subr.bf16.mxu1 %v3197_v29  ;;  %v3276_v28 = vld [vmem:[#allocation5 + $0x480] ss:$16 sps:$4 sm:$0xff]   ;;  %v3279_v29 = vld [vmem:[#allocation5 + $0x488] ss:$16 sps:$4 sm:$0xff]  }
  0xa4   :  { %1696 = vmatpush1.bf16.msra.mxu0 %v3192_v31  ;;  %1860 = vmatpush1.bf16.msra.mxu1 %v3195_v33  ;;  %v3287_v31 = vld [vmem:[#allocation5 + $0x4ac] ss:$16 sps:$4 sm:$0xff]   ;;  %v3285_v33 = vld [vmem:[#allocation5 + $0x4a8] ss:$16 sps:$4 sm:$0xff]  }
  0xa5   :  { %1697 = vmatprep.subr.bf16.mxu0 %v3200_v34  ;;  %1861 = vmatprep.subr.bf16.mxu1 %v3203_v35  ;;  %v3290_v34 = vld [vmem:[#allocation5 + $0x4c4] ss:$16 sps:$4 sm:$0xff]   ;;  %v3293_v35 = vld [vmem:[#allocation5 + $0x4cc] ss:$16 sps:$4 sm:$0xff]  }
  0xa8   :  { %1698 = vmatpush1.bf16.msra.mxu0 %v3198_v36  ;;  %1862 = vmatpush1.bf16.msra.mxu1 %v3201_v37  ;;  %v3288_v36 = vld [vmem:[#allocation5 + $0x4c0] ss:$16 sps:$4 sm:$0xff]   ;;  %v3291_v37 = vld [vmem:[#allocation5 + $0x4c8] ss:$16 sps:$4 sm:$0xff]  }
  0xa9   :  { %1699 = vmatprep.subr.bf16.mxu0 %v3206_v38  ;;  %1863 = vmatprep.subr.bf16.mxu1 %v3209_v39  ;;  %v3296_v38 = vld [vmem:[#allocation5 + $0x4e4] ss:$16 sps:$4 sm:$0xff]   ;;  %v3299_v39 = vld [vmem:[#allocation5 + $0x4ec] ss:$16 sps:$4 sm:$0xff]  }
  0xac   :  { %1700 = vmatpush1.bf16.msra.mxu0 %v3204_v40  ;;  %1864 = vmatpush1.bf16.msra.mxu1 %v3207_v41  ;;  %v3294_v40 = vld [vmem:[#allocation5 + $0x4e0] ss:$16 sps:$4 sm:$0xff]   ;;  %v3297_v41 = vld [vmem:[#allocation5 + $0x4e8] ss:$16 sps:$4 sm:$0xff]  }
  0xad   :  { %1701 = vmatprep.subr.bf16.mxu0 %v3212_v42  ;;  %1865 = vmatprep.subr.bf16.mxu1 %v3215_v43  ;;  %v3302_v42 = vld [vmem:[#allocation5 + $0x504] ss:$16 sps:$4 sm:$0xff]   ;;  %v3305_v43 = vld [vmem:[#allocation5 + $0x50c] ss:$16 sps:$4 sm:$0xff]  }
  0xb0   :  { %1702 = vmatpush1.bf16.msra.mxu0 %v3210_v44  ;;  %1866 = vmatpush1.bf16.msra.mxu1 %v3213_v45  ;;  %v3300_v44 = vld [vmem:[#allocation5 + $0x500] ss:$16 sps:$4 sm:$0xff]   ;;  %v3303_v45 = vld [vmem:[#allocation5 + $0x508] ss:$16 sps:$4 sm:$0xff]  }
  0xb1   :  { %1703 = vmatprep.subr.bf16.mxu0 %v3218_v46  ;;  %1867 = vmatprep.subr.bf16.mxu1 %v3221_v47  ;;  %v3308_v46 = vld [vmem:[#allocation5 + $0x524] ss:$16 sps:$4 sm:$0xff]   ;;  %v3311_v47 = vld [vmem:[#allocation5 + $0x52c] ss:$16 sps:$4 sm:$0xff]  }
  0xb4   :  { %1704 = vmatpush1.bf16.msra.mxu0 %v3216_v48  ;;  %1868 = vmatpush1.bf16.msra.mxu1 %v3219_v49  ;;  %v3306_v48 = vld [vmem:[#allocation5 + $0x520] ss:$16 sps:$4 sm:$0xff]   ;;  %v3309_v49 = vld [vmem:[#allocation5 + $0x528] ss:$16 sps:$4 sm:$0xff]  }
  0xb5   :  { %1705 = vmatprep.subr.bf16.mxu0 %v3224_v50  ;;  %1869 = vmatprep.subr.bf16.mxu1 %v3227_v51  ;;  %v3314_v50 = vld [vmem:[#allocation5 + $0x544] ss:$16 sps:$4 sm:$0xff]   ;;  %v3317_v51 = vld [vmem:[#allocation5 + $0x54c] ss:$16 sps:$4 sm:$0xff]  }
  0xb8   :  { %1706 = vmatpush1.bf16.msra.mxu0 %v3222_v52  ;;  %1870 = vmatpush1.bf16.msra.mxu1 %v3225_v53  ;;  %v3312_v52 = vld [vmem:[#allocation5 + $0x540] ss:$16 sps:$4 sm:$0xff]   ;;  %v3315_v53 = vld [vmem:[#allocation5 + $0x548] ss:$16 sps:$4 sm:$0xff]  }
  0xb9   :  { %1707 = vmatprep.subr.bf16.mxu0 %v3230_v54  ;;  %1871 = vmatprep.subr.bf16.mxu1 %v3233_v55  ;;  %v3320_v54 = vld [vmem:[#allocation5 + $0x564] ss:$16 sps:$4 sm:$0xff]   ;;  %v3323_v55 = vld [vmem:[#allocation5 + $0x56c] ss:$16 sps:$4 sm:$0xff]  }
  0xbc   :  { %1708 = vmatpush1.bf16.msra.mxu0 %v3228_v56  ;;  %1872 = vmatpush1.bf16.msra.mxu1 %v3231_v57  ;;  %v3318_v56 = vld [vmem:[#allocation5 + $0x560] ss:$16 sps:$4 sm:$0xff]   ;;  %v3321_v57 = vld [vmem:[#allocation5 + $0x568] ss:$16 sps:$4 sm:$0xff]  }
  0xbd   :  { %1709 = vmatprep.subr.bf16.mxu0 %v3236_v58  ;;  %1873 = vmatprep.subr.bf16.mxu1 %v3239_v59  ;;  %v3326_v58 = vld [vmem:[#allocation5 + $0x584] ss:$16 sps:$4 sm:$0xff]   ;;  %v3329_v59 = vld [vmem:[#allocation5 + $0x58c] ss:$16 sps:$4 sm:$0xff]  }
  0xc0   :  { %1710 = vmatpush1.bf16.msra.mxu0 %v3234_v60  ;;  %1874 = vmatpush1.bf16.msra.mxu1 %v3237_v61  ;;  %v3324_v60 = vld [vmem:[#allocation5 + $0x580] ss:$16 sps:$4 sm:$0xff]   ;;  %v3327_v61 = vld [vmem:[#allocation5 + $0x588] ss:$16 sps:$4 sm:$0xff]  }
  0xc1   :  { %1711 = vmatprep.subr.bf16.mxu0 %v3242_v62  ;;  %1875 = vmatprep.subr.bf16.mxu1 %v3245_v63  ;;  %v3332_v62 = vld [vmem:[#allocation5 + $0x5a4] ss:$16 sps:$4 sm:$0xff]   ;;  %v3335_v63 = vld [vmem:[#allocation5 + $0x5ac] ss:$16 sps:$4 sm:$0xff]  }
  0xc4   :  { %1712 = vmatpush1.bf16.msra.mxu0 %v3240_v0  ;;  %1876 = vmatpush1.bf16.msra.mxu1 %v3243_v1  ;;  %v3330_v0 = vld [vmem:[#allocation5 + $0x5a0] ss:$16 sps:$4 sm:$0xff]   ;;  %v3333_v1 = vld [vmem:[#allocation5 + $0x5a8] ss:$16 sps:$4 sm:$0xff]  }
  0xc5   :  { %1713 = vmatprep.subr.bf16.mxu0 %v3248_v2  ;;  %1877 = vmatprep.subr.bf16.mxu1 %v3251_v3  ;;  %v3338_v2 = vld [vmem:[#allocation5 + $0x5c4] ss:$16 sps:$4 sm:$0xff]   ;;  %v3341_v3 = vld [vmem:[#allocation5 + $0x5cc] ss:$16 sps:$4 sm:$0xff]  }
  0xc8   :  { %1714 = vmatpush1.bf16.msra.mxu0 %v3246_v4  ;;  %1878 = vmatpush1.bf16.msra.mxu1 %v3249_v5  ;;  %v3336_v4 = vld [vmem:[#allocation5 + $0x5c0] ss:$16 sps:$4 sm:$0xff]   ;;  %v3339_v5 = vld [vmem:[#allocation5 + $0x5c8] ss:$16 sps:$4 sm:$0xff]  }
  0xc9   :  { %1724 = vmatprep.subr.bf16.mxu0 %v3254_v6  ;;  %1888 = vmatprep.subr.bf16.mxu1 %v3257_v8  ;;  %v3344_v6 = vld [vmem:[#allocation5 + $0x5e4] ss:$16 sps:$4 sm:$0xff]   ;;  %v3342_v8 = vld [vmem:[#allocation5 + $0x5e0] ss:$16 sps:$4 sm:$0xff]  }
  0xcb   :  { %1716 = vmatmul.mubr.bf16.vlgmr.msra.gmra.mrb[0].mxu0 %v97_v11  ;;  %1880 = vmatmul.mubr.bf16.vlgmr.msra.gmra.mrb[0].mxu1 %v97_v11  ;;  %v3350_v11 = vld [vmem:[#allocation5 + $0x604] ss:$16 sps:$4 sm:$0xff]  }
  0xcc   :  { %1725 = vmatpush1.bf16.msra.mxu0 %v3252_v9  ;;  %1889 = vmatpush1.bf16.msra.mxu1 %v3255_v10  ;;  %v3345_v9 = vld [vmem:[#allocation5 + $0x5e8] ss:$16 sps:$4 sm:$0xff]   ;;  %v91_v10 = vld [vmem:[#allocation2 + $0x20] sm:$0xff] }
  0xcd   :  { %1726 = vmatprep.subr.bf16.mxu0 %v3260_v12  ;;  %1890 = vmatprep.subr.bf16.mxu1 %v3263_v13  ;;  %v3353_v12 = vld [vmem:[#allocation5 + $0x60c] ss:$16 sps:$4 sm:$0xff]  }
  0xce   :  { %1756 = vmatprep.mubr.bf16.mxu0 %v100_v15  ;;  %1920 = vmatprep.mubr.bf16.mxu1 %v100_v15  ;;  %v94_v13 = vld [vmem:[#allocation2 + $0x38] sm:$0xff] }
  0xcf   :  { %v3351_v15 = vld [vmem:[#allocation5 + $0x608] ss:$16 sps:$4 sm:$0xff]  }
  0xd0   :  { %1727 = vmatpush1.bf16.msra.mxu0 %v3258_v16  ;;  %1891 = vmatpush1.bf16.msra.mxu1 %v3261_v17  ;;  %v99_v16 = vpack.c.bf16 %v91_v10, %v91_v10  ;;  %v3356_v17 = vld [vmem:[#allocation5 + $0x624] ss:$16 sps:$4 sm:$0xff]  }
  0xd1   :  { %1728 = vmatprep.subr.bf16.mxu0 %v3266_v18  ;;  %1892 = vmatprep.subr.bf16.mxu1 %v3269_v19  ;;  %v3359_v18 = vld [vmem:[#allocation5 + $0x62c] ss:$16 sps:$4 sm:$0xff]   ;;  %v102_v19 = vpack.c.bf16 %v94_v13, %v94_v13 }
  0xd4   :  { %1729 = vmatpush1.bf16.msra.mxu0 %v3264_v20  ;;  %1893 = vmatpush1.bf16.msra.mxu1 %v3267_v21  ;;  %v3354_v20 = vld [vmem:[#allocation5 + $0x620] ss:$16 sps:$4 sm:$0xff]   ;;  %v3357_v21 = vld [vmem:[#allocation5 + $0x628] ss:$16 sps:$4 sm:$0xff]  }
  0xd5   :  { %1730 = vmatprep.subr.bf16.mxu0 %v3272_v22  ;;  %1894 = vmatprep.subr.bf16.mxu1 %v3275_v23  ;;  %v3362_v22 = vld [vmem:[#allocation5 + $0x644] ss:$16 sps:$4 sm:$0xff]   ;;  %v3365_v23 = vld [vmem:[#allocation5 + $0x64c] ss:$16 sps:$4 sm:$0xff]  }
  0xd8   :  { %1731 = vmatpush1.bf16.msra.mxu0 %v3270_v24  ;;  %1895 = vmatpush1.bf16.msra.mxu1 %v3273_v25  ;;  %v3360_v24 = vld [vmem:[#allocation5 + $0x640] ss:$16 sps:$4 sm:$0xff]   ;;  %v3363_v25 = vld [vmem:[#allocation5 + $0x648] ss:$16 sps:$4 sm:$0xff]  }
  0xd9   :  { %1732 = vmatprep.subr.bf16.mxu0 %v3278_v26  ;;  %1896 = vmatprep.subr.bf16.mxu1 %v3281_v27  ;;  %v3368_v26 = vld [vmem:[#allocation5 + $0x664] ss:$16 sps:$4 sm:$0xff]   ;;  %v3371_v27 = vld [vmem:[#allocation5 + $0x66c] ss:$16 sps:$4 sm:$0xff]  }
  0xdc   :  { %1733 = vmatpush1.bf16.msra.mxu0 %v3276_v28  ;;  %1897 = vmatpush1.bf16.msra.mxu1 %v3279_v29  ;;  %v3366_v28 = vld [vmem:[#allocation5 + $0x660] ss:$16 sps:$4 sm:$0xff]   ;;  %v3369_v29 = vld [vmem:[#allocation5 + $0x668] ss:$16 sps:$4 sm:$0xff]  }
  0xdd   :  { %1734 = vmatprep.subr.bf16.mxu0 %v3284_v30  ;;  %1898 = vmatprep.subr.bf16.mxu1 %v3287_v31  ;;  %v3374_v30 = vld [vmem:[#allocation5 + $0x684] ss:$16 sps:$4 sm:$0xff]   ;;  %v3377_v31 = vld [vmem:[#allocation5 + $0x68c] ss:$16 sps:$4 sm:$0xff]  }
  0xe0   :  { %1735 = vmatpush1.bf16.msra.mxu0 %v3282_v32  ;;  %1899 = vmatpush1.bf16.msra.mxu1 %v3285_v33  ;;  %v3372_v32 = vld [vmem:[#allocation5 + $0x680] ss:$16 sps:$4 sm:$0xff]   ;;  %v3375_v33 = vld [vmem:[#allocation5 + $0x688] ss:$16 sps:$4 sm:$0xff]  }
  0xe1   :  { %1736 = vmatprep.subr.bf16.mxu0 %v3290_v34  ;;  %1900 = vmatprep.subr.bf16.mxu1 %v3293_v35  ;;  %v3380_v34 = vld [vmem:[#allocation5 + $0x6a4] ss:$16 sps:$4 sm:$0xff]   ;;  %v3383_v35 = vld [vmem:[#allocation5 + $0x6ac] ss:$16 sps:$4 sm:$0xff]  }
  0xe4   :  { %1737 = vmatpush1.bf16.msra.mxu0 %v3288_v36  ;;  %1901 = vmatpush1.bf16.msra.mxu1 %v3291_v37  ;;  %v3378_v36 = vld [vmem:[#allocation5 + $0x6a0] ss:$16 sps:$4 sm:$0xff]   ;;  %v3381_v37 = vld [vmem:[#allocation5 + $0x6a8] ss:$16 sps:$4 sm:$0xff]  }
  0xe5   :  { %1738 = vmatprep.subr.bf16.mxu0 %v3296_v38  ;;  %1902 = vmatprep.subr.bf16.mxu1 %v3299_v39  ;;  %v3386_v38 = vld [vmem:[#allocation5 + $0x6c4] ss:$16 sps:$4 sm:$0xff]   ;;  %v3389_v39 = vld [vmem:[#allocation5 + $0x6cc] ss:$16 sps:$4 sm:$0xff]  }
  0xe8   :  { %1739 = vmatpush1.bf16.msra.mxu0 %v3294_v40  ;;  %1903 = vmatpush1.bf16.msra.mxu1 %v3297_v41  ;;  %v3384_v40 = vld [vmem:[#allocation5 + $0x6c0] ss:$16 sps:$4 sm:$0xff]   ;;  %v3387_v41 = vld [vmem:[#allocation5 + $0x6c8] ss:$16 sps:$4 sm:$0xff]  }
  0xe9   :  { %1740 = vmatprep.subr.bf16.mxu0 %v3302_v42  ;;  %1904 = vmatprep.subr.bf16.mxu1 %v3305_v43  ;;  %v3392_v42 = vld [vmem:[#allocation5 + $0x6e4] ss:$16 sps:$4 sm:$0xff]   ;;  %v3395_v43 = vld [vmem:[#allocation5 + $0x6ec] ss:$16 sps:$4 sm:$0xff]  }
  0xec   :  { %1741 = vmatpush1.bf16.msra.mxu0 %v3300_v44  ;;  %1905 = vmatpush1.bf16.msra.mxu1 %v3303_v45  ;;  %v3390_v44 = vld [vmem:[#allocation5 + $0x6e0] ss:$16 sps:$4 sm:$0xff]   ;;  %v3393_v45 = vld [vmem:[#allocation5 + $0x6e8] ss:$16 sps:$4 sm:$0xff]  }
  0xed   :  { %1742 = vmatprep.subr.bf16.mxu0 %v3308_v46  ;;  %1906 = vmatprep.subr.bf16.mxu1 %v3311_v47  ;;  %v3398_v46 = vld [vmem:[#allocation5 + $0x704] ss:$16 sps:$4 sm:$0xff]   ;;  %v3401_v47 = vld [vmem:[#allocation5 + $0x70c] ss:$16 sps:$4 sm:$0xff]  }
  0xf0   :  { %1743 = vmatpush1.bf16.msra.mxu0 %v3306_v48  ;;  %1907 = vmatpush1.bf16.msra.mxu1 %v3309_v49  ;;  %v3396_v48 = vld [vmem:[#allocation5 + $0x700] ss:$16 sps:$4 sm:$0xff]   ;;  %v3399_v49 = vld [vmem:[#allocation5 + $0x708] ss:$16 sps:$4 sm:$0xff]  }
  0xf1   :  { %1744 = vmatprep.subr.bf16.mxu0 %v3314_v50  ;;  %1908 = vmatprep.subr.bf16.mxu1 %v3317_v51  ;;  %v3404_v50 = vld [vmem:[#allocation5 + $0x724] ss:$16 sps:$4 sm:$0xff]   ;;  %v3407_v51 = vld [vmem:[#allocation5 + $0x72c] ss:$16 sps:$4 sm:$0xff]  }
  0xf4   :  { %1745 = vmatpush1.bf16.msra.mxu0 %v3312_v52  ;;  %1909 = vmatpush1.bf16.msra.mxu1 %v3315_v53  ;;  %v3402_v52 = vld [vmem:[#allocation5 + $0x720] ss:$16 sps:$4 sm:$0xff]   ;;  %v3405_v53 = vld [vmem:[#allocation5 + $0x728] ss:$16 sps:$4 sm:$0xff]  }
  0xf5   :  { %1746 = vmatprep.subr.bf16.mxu0 %v3320_v54  ;;  %1910 = vmatprep.subr.bf16.mxu1 %v3323_v55  ;;  %v3410_v54 = vld [vmem:[#allocation5 + $0x744] ss:$16 sps:$4 sm:$0xff]   ;;  %v3413_v55 = vld [vmem:[#allocation5 + $0x74c] ss:$16 sps:$4 sm:$0xff]  }
  0xf8   :  { %1747 = vmatpush1.bf16.msra.mxu0 %v3318_v56  ;;  %1911 = vmatpush1.bf16.msra.mxu1 %v3321_v57  ;;  %v3408_v56 = vld [vmem:[#allocation5 + $0x740] ss:$16 sps:$4 sm:$0xff]   ;;  %v3411_v57 = vld [vmem:[#allocation5 + $0x748] ss:$16 sps:$4 sm:$0xff]  }
  0xf9   :  { %1748 = vmatprep.subr.bf16.mxu0 %v3326_v58  ;;  %1912 = vmatprep.subr.bf16.mxu1 %v3329_v59  ;;  %v3416_v58 = vld [vmem:[#allocation5 + $0x764] ss:$16 sps:$4 sm:$0xff]   ;;  %v3419_v59 = vld [vmem:[#allocation5 + $0x76c] ss:$16 sps:$4 sm:$0xff]  }
  0xfc   :  { %1749 = vmatpush1.bf16.msra.mxu0 %v3324_v60  ;;  %1913 = vmatpush1.bf16.msra.mxu1 %v3327_v61  ;;  %v3414_v60 = vld [vmem:[#allocation5 + $0x760] ss:$16 sps:$4 sm:$0xff]   ;;  %v3417_v61 = vld [vmem:[#allocation5 + $0x768] ss:$16 sps:$4 sm:$0xff]  }
  0xfd   :  { %1750 = vmatprep.subr.bf16.mxu0 %v3332_v62  ;;  %1914 = vmatprep.subr.bf16.mxu1 %v3335_v63  ;;  %v3422_v62 = vld [vmem:[#allocation5 + $0x784] ss:$16 sps:$4 sm:$0xff]   ;;  %v3425_v63 = vld [vmem:[#allocation5 + $0x78c] ss:$16 sps:$4 sm:$0xff]  }
 0x100   :  { %1751 = vmatpush1.bf16.msra.mxu0 %v3330_v0  ;;  %1915 = vmatpush1.bf16.msra.mxu1 %v3333_v1  ;;  %v3420_v0 = vld [vmem:[#allocation5 + $0x780] ss:$16 sps:$4 sm:$0xff]   ;;  %v3423_v1 = vld [vmem:[#allocation5 + $0x788] ss:$16 sps:$4 sm:$0xff]  }
 0x101   :  { %1752 = vmatprep.subr.bf16.mxu0 %v3338_v2  ;;  %1916 = vmatprep.subr.bf16.mxu1 %v3341_v3  ;;  %v3428_v2 = vld [vmem:[#allocation5 + $0x7a4] ss:$16 sps:$4 sm:$0xff]   ;;  %v3431_v3 = vld [vmem:[#allocation5 + $0x7ac] ss:$16 sps:$4 sm:$0xff]  }
 0x104   :  { %1753 = vmatpush1.bf16.msra.mxu0 %v3336_v4  ;;  %1917 = vmatpush1.bf16.msra.mxu1 %v3339_v5  ;;  %v351_v4 = vld [vmem:[#allocation5 + $0x7c0] sm:$0xff]  ;;  %v352_v5 = vld [vmem:[#allocation5 + $0x7c8] sm:$0xff] }
 0x105   :  { %1754 = vmatprep.subr.bf16.mxu0 %v3344_v6  ;;  %1918 = vmatprep.subr.bf16.mxu1 %v3347_v7  ;;  %v3426_v6 = vld [vmem:[#allocation5 + $0x7a0] ss:$16 sps:$4 sm:$0xff]   ;;  %v3429_v7 = vld [vmem:[#allocation5 + $0x7a8] ss:$16 sps:$4 sm:$0xff]   ;;  %v2897_v10 = vcombine.low %v351_v4, %v351_v4 }
 0x107   :  { %v1631_v13 = vsel %vm1629_vm1, %v2897_v10, 0 }
 0x108   :  { %1755 = vmatpush1.bf16.msra.mxu0 %v3342_v8  ;;  %1919 = vmatpush1.bf16.msra.mxu1 %v3345_v9  ;;  %v2898_v8 = vcombine.high %v351_v4, %v351_v4  ;;  %v2900_v9 = vcombine.high %v352_v5, %v352_v5 }
 0x109   :  { %1765 = vmatprep.subr.bf16.mxu0 %v3350_v11  ;;  %1929 = vmatprep.subr.bf16.mxu1 %v3353_v12  ;;  %v2899_v11 = vcombine.low %v352_v5, %v352_v5  ;;  %v93_v12 = vld [vmem:[#allocation2 + $0x30] sm:$0xff] }
 0x10b   :  { %1757 = vmatmul.mubr.bf16.vlgmr.msra.gmra.mrb[0].mxu0 %v99_v16  ;;  %1921 = vmatmul.mubr.bf16.vlgmr.msra.gmra.mrb[0].mxu1 %v99_v16  ;;  %v3436_v16 = vld [vmem:[#allocation7 + $0x40] sm:$0xff]  }
 0x10c   :  { %1766 = vmatpush1.bf16.msra.mxu0 %v3348_v14  ;;  %1930 = vmatpush1.bf16.msra.mxu1 %v3351_v15  ;;  %v1637_v14 = vsel %vm1629_vm1, %v2899_v11, 0  ;;  %v101_v15 = vpack.c.bf16 %v93_v12, %v93_v12 }
 0x10d   :  { %1767 = vmatprep.subr.bf16.mxu0 %v3356_v17  ;;  %1931 = vmatprep.subr.bf16.mxu1 %v3359_v18  ;;  %v3437_v17 = vld [vmem:[#allocation7 + $0xc0] sm:$0xff]  }
 0x10e   :  { %2902 = vmatprep.mubr.msk.bf16.mxu0 %vm1625_vm0, %v102_v19  ;;  %2904 = vmatprep.mubr.msk.bf16.mxu1 %vm1625_vm0, %v102_v19  ;;  %v3438_v18 = vld [vmem:[#allocation7] sm:$0xff]  }
 0x10f   :  { %v3439_v19 = vld [vmem:[#allocation7 + $0x80] sm:$0xff]  }
 0x110   :  { %1768 = vmatpush1.bf16.msra.mxu0 %v3354_v20  ;;  %1932 = vmatpush1.bf16.msra.mxu1 %v3357_v21  ;;  %v3440_v20 = vld [vmem:[#allocation7 + $0x48] sm:$0xff]  }
 0x111   :  { %1769 = vmatprep.subr.bf16.mxu0 %v3362_v22  ;;  %1933 = vmatprep.subr.bf16.mxu1 %v3365_v23  ;;  %v3441_v21 = vld [vmem:[#allocation7 + $0xc8] sm:$0xff]  }
 0x112   :  { %v3442_v22 = vld [vmem:[#allocation7 + $0x8] sm:$0xff]  }
 0x113   :  { %v3443_v23 = vld [vmem:[#allocation7 + $0x88] sm:$0xff]  }
 0x114   :  { %1770 = vmatpush1.bf16.msra.mxu0 %v3360_v24  ;;  %1934 = vmatpush1.bf16.msra.mxu1 %v3363_v25  ;;  %v3444_v24 = vld [vmem:[#allocation7 + $0x50] sm:$0xff]  }
 0x115   :  { %1771 = vmatprep.subr.bf16.mxu0 %v3368_v26  ;;  %1935 = vmatprep.subr.bf16.mxu1 %v3371_v27  ;;  %v3445_v25 = vld [vmem:[#allocation7 + $0xd0] sm:$0xff]  }
 0x116   :  { %v3446_v26 = vld [vmem:[#allocation7 + $0x10] sm:$0xff]  }
 0x117   :  { %v3447_v27 = vld [vmem:[#allocation7 + $0x90] sm:$0xff]  }
 0x118   :  { %1772 = vmatpush1.bf16.msra.mxu0 %v3366_v28  ;;  %1936 = vmatpush1.bf16.msra.mxu1 %v3369_v29  ;;  %v3448_v28 = vld [vmem:[#allocation7 + $0x58] sm:$0xff]  }
 0x119   :  { %1773 = vmatprep.subr.bf16.mxu0 %v3374_v30  ;;  %1937 = vmatprep.subr.bf16.mxu1 %v3377_v31  ;;  %v3449_v29 = vld [vmem:[#allocation7 + $0xd8] sm:$0xff]  }
 0x11a   :  { %v3450_v30 = vld [vmem:[#allocation7 + $0x18] sm:$0xff]  }
 0x11b   :  { %v3451_v31 = vld [vmem:[#allocation7 + $0x98] sm:$0xff]  }
 0x11c   :  { %1774 = vmatpush1.bf16.msra.mxu0 %v3372_v32  ;;  %1938 = vmatpush1.bf16.msra.mxu1 %v3375_v33  ;;  %v3452_v32 = vld [vmem:[#allocation7 + $0x60] sm:$0xff]  }
 0x11d   :  { %1775 = vmatprep.subr.bf16.mxu0 %v3380_v34  ;;  %1939 = vmatprep.subr.bf16.mxu1 %v3383_v35  ;;  %v3453_v33 = vld [vmem:[#allocation7 + $0xe0] sm:$0xff]  }
 0x11e   :  { %v3454_v34 = vld [vmem:[#allocation7 + $0x20] sm:$0xff]  }
 0x11f   :  { %v3455_v35 = vld [vmem:[#allocation7 + $0xa0] sm:$0xff]  }
 0x120   :  { %1776 = vmatpush1.bf16.msra.mxu0 %v3378_v36  ;;  %1940 = vmatpush1.bf16.msra.mxu1 %v3381_v37  ;;  %v3456_v36 = vld [vmem:[#allocation7 + $0x68] sm:$0xff]  }
 0x121   :  { %1777 = vmatprep.subr.bf16.mxu0 %v3386_v38  ;;  %1941 = vmatprep.subr.bf16.mxu1 %v3389_v39  ;;  %v3457_v37 = vld [vmem:[#allocation7 + $0xe8] sm:$0xff]  }
 0x122   :  { %v3458_v38 = vld [vmem:[#allocation7 + $0x28] sm:$0xff]  }
 0x123   :  { %v3459_v39 = vld [vmem:[#allocation7 + $0xa8] sm:$0xff]  }
 0x124   :  { %1778 = vmatpush1.bf16.msra.mxu0 %v3384_v40  ;;  %1942 = vmatpush1.bf16.msra.mxu1 %v3387_v41  ;;  %v3460_v40 = vld [vmem:[#allocation7 + $0x70] sm:$0xff]  }
 0x125   :  { %1779 = vmatprep.subr.bf16.mxu0 %v3392_v42  ;;  %1943 = vmatprep.subr.bf16.mxu1 %v3395_v43  ;;  %v3461_v41 = vld [vmem:[#allocation7 + $0xf0] sm:$0xff]  }
 0x126   :  { %v3462_v42 = vld [vmem:[#allocation7 + $0x30] sm:$0xff]  }
 0x127   :  { %v3463_v43 = vld [vmem:[#allocation7 + $0xb0] sm:$0xff]  }
 0x128   :  { %1780 = vmatpush1.bf16.msra.mxu0 %v3390_v44  ;;  %1944 = vmatpush1.bf16.msra.mxu1 %v3393_v45  ;;  %v3464_v44 = vld [vmem:[#allocation7 + $0x78] sm:$0xff]  }
 0x129   :  { %1781 = vmatprep.subr.bf16.mxu0 %v3398_v46  ;;  %1945 = vmatprep.subr.bf16.mxu1 %v3401_v47  ;;  %v3465_v45 = vld [vmem:[#allocation7 + $0xf8] sm:$0xff]  }
 0x12a   :  { %v3466_v46 = vld [vmem:[#allocation7 + $0x38] sm:$0xff]  }
 0x12b   :  { %v3467_v47 = vld [vmem:[#allocation7 + $0xb8] sm:$0xff]  }
 0x12c   :  { %1782 = vmatpush1.bf16.msra.mxu0 %v3396_v48  ;;  %1946 = vmatpush1.bf16.msra.mxu1 %v3399_v49  ;;  %v3610_v48 = vmov 0.0   ;;  %v355_v49 = vlaneseq }
 0x12d   :  { %1783 = vmatprep.subr.bf16.mxu0 %v3404_v50  ;;  %1947 = vmatprep.subr.bf16.mxu1 %v3407_v51 }
 0x12e   :  { %v3715_v50 = vshrl.u32 %v355_v49, 7 }
 0x130   :  { %1784 = vmatpush1.bf16.msra.mxu0 %v3402_v52  ;;  %1948 = vmatpush1.bf16.msra.mxu1 %v3405_v53  ;;  %v3718_v51 = vsub.s32 0, %v3715_v50  ;;  %v3721_v52 = vsub.s32 2, %v3715_v50  ;;  %v353_v53 = vld [vmem:[%s3807_s2] sm:$0xf] }
 0x131   :  { %1785 = vmatprep.subr.bf16.mxu0 %v3410_v54  ;;  %1949 = vmatprep.subr.bf16.mxu1 %v3413_v55  ;;  %v3727_v54 = vsub.s32 1, %v3715_v50  ;;  %v3730_v55 = vsub.s32 3, %v3715_v50 }
 0x134   :  { %1786 = vmatpush1.bf16.msra.mxu0 %v3408_v56  ;;  %1950 = vmatpush1.bf16.msra.mxu1 %v3411_v57  ;;  %v358_v56 = vrot.slane %v353_v53, %v3718_v51  ;;  %v366_v57 = vrot.slane %v353_v53, %v3721_v52 }
 0x135   :  { %1787 = vmatprep.subr.bf16.mxu0 %v3416_v58  ;;  %1951 = vmatprep.subr.bf16.mxu1 %v3419_v59  ;;  %v362_v58 = vrot.slane %v353_v53, %v3727_v54  ;;  %v370_v59 = vrot.slane %v353_v53, %v3730_v55 }
 0x138   :  { %1788 = vmatpush1.bf16.msra.mxu0 %v3414_v60  ;;  %1952 = vmatpush1.bf16.msra.mxu1 %v3417_v61 }
 0x139   :  { %1789 = vmatprep.subr.bf16.mxu0 %v3422_v62  ;;  %1953 = vmatprep.subr.bf16.mxu1 %v3425_v63 }
 0x13c   :  { %1790 = vmatpush1.bf16.msra.mxu0 %v3420_v0  ;;  %1954 = vmatpush1.bf16.msra.mxu1 %v3423_v1 }
 0x13d   :  { %1791 = vmatprep.subr.bf16.mxu0 %v3428_v2  ;;  %1955 = vmatprep.subr.bf16.mxu1 %v3431_v3 }
 0x140   :  { %1792 = vmatpush1.bf16.msra.mxu0 %v3426_v6  ;;  %1956 = vmatpush1.bf16.msra.mxu1 %v3429_v7 }
 0x141   :  { %2901 = vmatprep.subr.msk.bf16.mxu0 %vm1629_vm1, %v2898_v8  ;;  %2903 = vmatprep.subr.msk.bf16.mxu1 %vm1629_vm1, %v2900_v9 }
 0x144   :  { %1794 = vmatpush1.bf16.msra.mxu0 %v1631_v13  ;;  %1958 = vmatpush1.bf16.msra.mxu1 %v1637_v14 }
 0x145   :  { %2947 = vmatprep.subr.bf16.mxu0 %v3436_v16  ;;  %2969 = vmatprep.subr.bf16.mxu1 %v3437_v17 }
 0x147   :  { %1798 = vmatmul.mubr.bf16.vlgmr.msra.gmra.mrb[0].mxu0 %v101_v15  ;;  %1962 = vmatmul.mubr.bf16.vlgmr.msra.gmra.mrb[0].mxu1 %v101_v15 }
 0x148   :  { %2948 = vmatpush3.bf16.msra.mxu0 %v3438_v18  ;;  %2970 = vmatpush3.bf16.msra.mxu1 %v3439_v19 }
 0x149   :  { %2949 = vmatprep.subr.bf16.mxu0 %v3440_v20  ;;  %2971 = vmatprep.subr.bf16.mxu1 %v3441_v21 }
 0x14c   :  { %2950 = vmatpush3.bf16.msra.mxu0 %v3442_v22  ;;  %2972 = vmatpush3.bf16.msra.mxu1 %v3443_v23 }
 0x14d   :  { %2951 = vmatprep.subr.bf16.mxu0 %v3444_v24  ;;  %2973 = vmatprep.subr.bf16.mxu1 %v3445_v25 }
 0x150   :  { %2952 = vmatpush3.bf16.msra.mxu0 %v3446_v26  ;;  %2974 = vmatpush3.bf16.msra.mxu1 %v3447_v27 }
 0x151   :  { %2953 = vmatprep.subr.bf16.mxu0 %v3448_v28  ;;  %2975 = vmatprep.subr.bf16.mxu1 %v3449_v29 }
 0x154   :  { %2954 = vmatpush3.bf16.msra.mxu0 %v3450_v30  ;;  %2976 = vmatpush3.bf16.msra.mxu1 %v3451_v31 }
 0x155   :  { %2955 = vmatprep.subr.bf16.mxu0 %v3452_v32  ;;  %2977 = vmatprep.subr.bf16.mxu1 %v3453_v33 }
 0x158   :  { %2956 = vmatpush3.bf16.msra.mxu0 %v3454_v34  ;;  %2978 = vmatpush3.bf16.msra.mxu1 %v3455_v35 }
 0x159   :  { %2957 = vmatprep.subr.bf16.mxu0 %v3456_v36  ;;  %2979 = vmatprep.subr.bf16.mxu1 %v3457_v37 }
 0x15c   :  { %2958 = vmatpush3.bf16.msra.mxu0 %v3458_v38  ;;  %2980 = vmatpush3.bf16.msra.mxu1 %v3459_v39 }
 0x15d   :  { %2959 = vmatprep.subr.bf16.mxu0 %v3460_v40  ;;  %2981 = vmatprep.subr.bf16.mxu1 %v3461_v41 }
 0x160   :  { %2960 = vmatpush3.bf16.msra.mxu0 %v3462_v42  ;;  %2982 = vmatpush3.bf16.msra.mxu1 %v3463_v43 }
 0x161   :  { %2961 = vmatprep.subr.bf16.mxu0 %v3464_v44  ;;  %2983 = vmatprep.subr.bf16.mxu1 %v3465_v45 }
 0x164   :  { %2962 = vmatpush3.bf16.msra.mxu0 %v3466_v46  ;;  %2984 = vmatpush3.bf16.msra.mxu1 %v3467_v47 }
 0x165   :  { %3000 = vmatprep.subr.bf16.mxu0 %v3610_v48 }
 0x21a   :  { %v1799_v60 = vpop.f32.mrb[0].mxu0  ;;  %v1963_v61 = vpop.f32.mrb[0].mxu1 }
 0x21b   :  { %v3020_v62 = vadd.f32 %v1799_v60, %v358_v56  ;;  %v3022_v63 = vadd.f32 %v1963_v61, %v366_v57  ;;  %v1801_v0 = vpop.f32.mrb[1].mxu0  ;;  %v1965_v1 = vpop.f32.mrb[1].mxu1 }
 0x21c   :  { %v3021_v2 = vadd.f32 %v1801_v0, %v362_v58  ;;  %v3023_v3 = vadd.f32 %v1965_v1, %v370_v59  ;;  %v1803_v4 = vpop.f32.mrb[2].mxu0  ;;  %v1967_v5 = vpop.f32.mrb[2].mxu1 }
 0x21d   :  { %v3736_v6 = vmax.f32 %v3020_v62, 0.0  ;;  %v3738_v7 = vmax.f32 %v3022_v63, 0.0  ;;  %v1804_v8 = vpop.f32.mrb[3].mxu0  ;;  %v1968_v9 = vpop.f32.mrb[3].mxu1 }
 0x21e   :  { %v3740_v10 = vmax.f32 %v3021_v2, 0.0  ;;  %v3742_v11 = vmax.f32 %v3023_v3, 0.0 }
 0x21f   :  { %v1974_v12 = vrot.slane %v3736_v6, 4  ;;  %v1998_v13 = vmul.f32 %v3736_v6, %v3736_v6  ;;  %v1986_v14 = vrot.slane %v3738_v7, 4  ;;  %v2000_v15 = vmul.f32 %v3738_v7, %v3738_v7 }
 0x220   :  { %v1980_v16 = vrot.slane %v3740_v10, 4  ;;  %v1999_v17 = vmul.f32 %v3740_v10, %v3740_v10  ;;  %v1992_v18 = vrot.slane %v3742_v11, 4  ;;  %v2001_v19 = vmul.f32 %v3742_v11, %v3742_v11 }
 0x221   :  { %v1975_v20 = vadd.f32 %v1974_v12, %v3736_v6  ;;  %v2002_v21 = vrot.slane %v1998_v13, 4  ;;  %v1987_v22 = vadd.f32 %v1986_v14, %v3738_v7  ;;  %v2014_v23 = vrot.slane %v2000_v15, 4 }
 0x222   :  { %v1981_v24 = vadd.f32 %v1980_v16, %v3740_v10  ;;  %v2008_v25 = vrot.slane %v1999_v17, 4  ;;  %v1993_v26 = vadd.f32 %v1992_v18, %v3742_v11  ;;  %v2020_v27 = vrot.slane %v2001_v19, 4 }
 0x223   :  { %v1976_v28 = vrot.slane %v1975_v20, 2  ;;  %v2003_v29 = vadd.f32 %v2002_v21, %v1998_v13  ;;  %v1988_v30 = vrot.slane %v1987_v22, 2  ;;  %v2015_v31 = vadd.f32 %v2014_v23, %v2000_v15 }
 0x224   :  { %v1982_v32 = vrot.slane %v1981_v24, 2  ;;  %v2009_v33 = vadd.f32 %v2008_v25, %v1999_v17  ;;  %v1994_v34 = vrot.slane %v1993_v26, 2  ;;  %v2021_v35 = vadd.f32 %v2020_v27, %v2001_v19 }
 0x225   :  { %v1977_v36 = vadd.f32 %v1976_v28, %v1975_v20  ;;  %v2004_v37 = vrot.slane %v2003_v29, 2  ;;  %v1989_v38 = vadd.f32 %v1988_v30, %v1987_v22  ;;  %v2016_v39 = vrot.slane %v2015_v31, 2 }
 0x226   :  { %v1983_v40 = vadd.f32 %v1982_v32, %v1981_v24  ;;  %v2010_v41 = vrot.slane %v2009_v33, 2  ;;  %v1995_v42 = vadd.f32 %v1994_v34, %v1993_v26  ;;  %v2022_v43 = vrot.slane %v2021_v35, 2 }
 0x227   :  { %v1978_v44 = vrot.slane %v1977_v36, 1  ;;  %v2005_v45 = vadd.f32 %v2004_v37, %v2003_v29  ;;  %v1990_v46 = vrot.slane %v1989_v38, 1  ;;  %v2017_v47 = vadd.f32 %v2016_v39, %v2015_v31 }
 0x228   :  { %v1984_v49 = vrot.slane %v1983_v40, 1  ;;  %v2011_v53 = vadd.f32 %v2010_v41, %v2009_v33  ;;  %v1996_v56 = vrot.slane %v1995_v42, 1  ;;  %v2023_v57 = vadd.f32 %v2022_v43, %v2021_v35 }
 0x229   :  { %v1979_v58 = vadd.f32 %v1978_v44, %v1977_v36  ;;  %v2006_v59 = vrot.slane %v2005_v45, 1  ;;  %v1991_v60 = vadd.f32 %v1990_v46, %v1989_v38  ;;  %v2018_v61 = vrot.slane %v2017_v47, 1 }
 0x22a   :  { %v1985_v62 = vadd.f32 %v1984_v49, %v1983_v40  ;;  %v2012_v63 = vrot.slane %v2011_v53, 1  ;;  %v1997_v0 = vadd.f32 %v1996_v56, %v1995_v42  ;;  %v2024_v1 = vrot.slane %v2023_v57, 1 }
 0x22b   :  { %v2007_v2 = vadd.f32 %v2006_v59, %v2005_v45  ;;  %v2026_v3 = vmul.f32 0.125, %v1979_v58  ;;  %v2019_v4 = vadd.f32 %v2018_v61, %v2017_v47  ;;  %v2028_v5 = vmul.f32 0.125, %v1991_v60  ;;  %v2046_v47 = vld [vmem:[%s3808_s3] sm:$0xf] }
 0x22c   :  { %v2013_v8 = vadd.f32 %v2012_v63, %v2011_v53  ;;  %v2027_v9 = vmul.f32 0.125, %v1985_v62  ;;  %v2025_v12 = vadd.f32 %v2024_v1, %v2023_v57  ;;  %v2029_v13 = vmul.f32 0.125, %v1997_v0 }
 0x22d   :  { %v2030_v14 = vmul.f32 0.125, %v2007_v2  ;;  %v2034_v15 = vmul.f32 %v2026_v3, %v2026_v3  ;;  %v2032_v16 = vmul.f32 0.125, %v2019_v4  ;;  %v2036_v17 = vmul.f32 %v2028_v5, %v2028_v5 }
 0x22e   :  { %v2031_v18 = vmul.f32 0.125, %v2013_v8  ;;  %v2035_v19 = vmul.f32 %v2027_v9, %v2027_v9  ;;  %v2033_v20 = vmul.f32 0.125, %v2025_v12  ;;  %v2037_v21 = vmul.f32 %v2029_v13, %v2029_v13 }
 0x22f   :  { %v2038_v22 = vsub.f32 %v2030_v14, %v2034_v15  ;;  %v2040_v23 = vsub.f32 %v2032_v16, %v2036_v17  ;;  %v3611_v34 = vmov 1966171168  }
 0x230   :  { %v2039_v24 = vsub.f32 %v2031_v18, %v2035_v19  ;;  %v2041_v25 = vsub.f32 %v2033_v20, %v2037_v21  ;;  %v2062_v35 = vunpack.c.l.s4 %v3611_v34 }
 0x231   :  { %v2042_v26 = vmax.f32 %v2038_v22, 0.0  ;;  %v2044_v27 = vmax.f32 %v2040_v23, 0.0  ;;  %v3468_v23 = vld [vmem:[#allocation8] sm:$0xff]  }
 0x232   :  { %v2043_v28 = vmax.f32 %v2039_v24, 0.0  ;;  %v2045_v29 = vmax.f32 %v2041_v25, 0.0  ;;  %v2063_v36 = vunpack.c.0.s8 %v2062_v35  ;;  %v3473_v24 = vld [vmem:[#allocation8 + $0x28] sm:$0xff]   ;;  %v3474_v25 = vld [vmem:[#allocation8 + $0x30] sm:$0xff]  }
 0x233   :  { %v2047_v30 = vadd.f32 1e-05, %v2042_v26  ;;  %v2049_v31 = vadd.f32 1e-05, %v2044_v27  ;;  %v3475_v26 = vld [vmem:[#allocation8 + $0x38] sm:$0xff]  }
 0x234   :  { %v2048_v32 = vadd.f32 1e-05, %v2043_v28  ;;  %v2050_v33 = vadd.f32 1e-05, %v2045_v29  ;;  %v2066_v39 = vsub.s32 %v2063_v36, %v3715_v50  ;;  %v2905_v29 = vld [vmem:[%s3811_s6] ss:$0 sm:$0xff] }
 0x235   :  { %3476 = vrsqrt.f32 %v2047_v30  ;;  %s2638_s6 = sshll.u32 %s3613_s21, 4  ;;  %s2639_s6 = int_to_ptr.vmem [resolvable:$true] %s2638_s6 }
 0x236   :  { %3478 = vrsqrt.f32 %v2049_v31  ;;  %s3572_s22 = scalar_lea.vmem %s2639_s6, 128  ;;  %p3577_p5 = scmp.lt.s32.totalorder %s2639_s6, %s2639_s6 }
 0x237   :  { %3480 = vrsqrt.f32 %v2048_v32  ;;  %p3573_p4 = scmp.ne.s32.totalorder %s2639_s6, %s3572_s22  ;;  %p3578_p6 = scmp.lt.s32.totalorder %s3572_s22, %s3572_s22 }
 0x238   :  { %3482 = vrsqrt.f32 %v2050_v33 }
 0x239   :  { %p3579_p7 = por %p3578_p6, %p3577_p5 }
 0x23b   :  { %p3580_p8 = pnand %p3579_p7, %p3573_p4 }
 0x23f   :  { %v3477_v37 = vpop.eup %3476 }
 0x240   :  { %v3479_v38 = vpop.eup %3478 }
 0x241   :  { %v3481_v40 = vpop.eup %3480 }
 0x242   :  { %v3483_v41 = vpop.eup %3482  ;;  %v2059_v42 = vcombine.low %v3477_v37, %v3481_v40 }
 0x243   :  { %v2060_v43 = vcombine.low %v3479_v38, %v3483_v41 }
 0x244   :  { %v2067_v44 = vrot.slane %v2059_v42, %v2066_v39 }
 0x245   :  { %v2074_v45 = vrot.slane %v2060_v43, %v2066_v39 }
 0x247   :  { %v2075_v46 = vcombine.low %v2067_v44, %v2074_v45 }
 0x249   :  { %v2082_v49 = vrot.slane %v2075_v46, %v2066_v39 }
 0x24b   :  { %v2084_v53 = vmul.f32 %v2082_v49, %v2046_v47 }
 0x24d   :  { %v2098_v56 = vrot.slane %v2084_v53, %v3721_v52  ;;  %v2102_v57 = vrot.slane %v2084_v53, %v3730_v55  ;;  %v2090_v58 = vrot.slane %v2084_v53, %v3718_v51  ;;  %v2094_v50 = vrot.slane %v2084_v53, %v3727_v54 }
 0x24f   :  { %v2109_v59 = vmul.f32 %v2098_v56, %v2028_v5  ;;  %v2110_v60 = vmul.f32 %v2102_v57, %v2029_v13  ;;  %v2107_v61 = vmul.f32 %v2090_v58, %v2026_v3  ;;  %v2108_v62 = vmul.f32 %v2094_v50, %v2027_v9  ;;  %v2085_v5 = vld [vmem:[%s3809_s4] sm:$0xf] }
 0x250   :  { %v2142_v63 = vmul.f32 %v2094_v50, %v3740_v10  ;;  %v2144_v0 = vmul.f32 %v2102_v57, %v3742_v11  ;;  %v2141_v1 = vmul.f32 %v2090_v58, %v3736_v6  ;;  %v2143_v2 = vmul.f32 %v2098_v56, %v3738_v7 }
 0x251   :  { %v2116_v4 = vcombine.low %v2109_v59, %v2110_v60  ;;  %v2115_v8 = vcombine.low %v2107_v61, %v2108_v62 }
 0x253   :  { %v2130_v12 = vrot.slane %v2116_v4, %v2066_v39  ;;  %v2123_v14 = vrot.slane %v2115_v8, %v2066_v39 }
 0x255   :  { %v2131_v15 = vcombine.low %v2123_v14, %v2130_v12 }
 0x257   :  { %v2138_v13 = vrot.slane %v2131_v15, %v2066_v39 }
 0x259   :  { %v2140_v3 = vsub.f32 %v2085_v5, %v2138_v13 }
 0x25b   :  { %v2153_v9 = vrot.slane %v2140_v3, %v3727_v54  ;;  %v2161_v10 = vrot.slane %v2140_v3, %v3730_v55  ;;  %v2149_v11 = vrot.slane %v2140_v3, %v3718_v51  ;;  %v2157_v6 = vrot.slane %v2140_v3, %v3721_v52  ;;  %v3469_v54 = vld [vmem:[#allocation8 + $0x8] sm:$0xff]   ;;  %v3470_v51 = vld [vmem:[#allocation8 + $0x10] sm:$0xff]   ;;  %v3471_v52 = vld [vmem:[#allocation8 + $0x18] sm:$0xff]  }
 0x25c   :  { %v3472_v55 = vld [vmem:[#allocation8 + $0x20] sm:$0xff]  }
 0x25d   :  { %v2167_v7 = vadd.f32 %v2153_v9, %v2142_v63  ;;  %v2169_v16 = vadd.f32 %v2161_v10, %v2144_v0  ;;  %v2166_v17 = vadd.f32 %v2149_v11, %v2141_v1  ;;  %v2168_v18 = vadd.f32 %v2157_v6, %v2143_v2 }
 0x25f   :  { %v2171_v19 = vpack.c.bf16 %v2167_v7, %v2167_v7  ;;  %v2173_v20 = vpack.c.bf16 %v2169_v16, %v2169_v16  ;;  %v2170_v21 = vpack.c.bf16 %v2166_v17, %v2166_v17  ;;  %v2172_v22 = vpack.c.bf16 %v2168_v18, %v2168_v18 }
 0x261   :  { %2469 = vmatprep.mubr.bf16.mxu0 %v2171_v19  ;;  %2509 = vmatprep.mubr.bf16.mxu1 %v2173_v20 }
 0x262   :  { %2470 = vmatmul.mubr.bf16.vlgmr.msra.gmra.mrb[4].mxu0 %v2170_v21  ;;  %2510 = vmatmul.mubr.bf16.vlgmr.msra.gmra.mrb[4].mxu1 %v2172_v22 }
 0x263   :  { %3001 = vmatpush3.bf16.msra.mxu0 %v3468_v23  ;;  %3016 = vmatprep.mubr.msk.bf16.mxu0 %vm3612_vm2, %v3610_v48 }
 0x264   :  { %3002 = vmatprep.subr.bf16.mxu0 %v3610_v48 }
 0x267   :  { %3003 = vmatpush3.bf16.msra.mxu0 %v3469_v54 }
 0x268   :  { %3004 = vmatprep.subr.bf16.mxu0 %v3610_v48 }
 0x26b   :  { %3005 = vmatpush3.bf16.msra.mxu0 %v3470_v51 }
 0x26c   :  { %3006 = vmatprep.subr.bf16.mxu0 %v3610_v48 }
 0x26f   :  { %3007 = vmatpush3.bf16.msra.mxu0 %v3471_v52 }
 0x270   :  { %3008 = vmatprep.subr.bf16.mxu0 %v3610_v48 }
 0x273   :  { %3009 = vmatpush3.bf16.msra.mxu0 %v3472_v55 }
 0x274   :  { %3010 = vmatprep.subr.bf16.mxu0 %v3610_v48 }
 0x277   :  { %3011 = vmatpush3.bf16.msra.mxu0 %v3473_v24 }
 0x278   :  { %3012 = vmatprep.subr.bf16.mxu0 %v3610_v48 }
 0x27b   :  { %3013 = vmatpush3.bf16.msra.mxu0 %v3474_v25 }
 0x27c   :  { %3014 = vmatprep.subr.bf16.mxu0 %v3610_v48  ;;  %v2938_v48 = vld [vmem:[%s3813_s8] ss:$0 sm:$0xff] }
 0x27f   :  { %3015 = vmatpush3.bf16.msra.mxu0 %v3475_v26 }
 0x335   :  { %v2963_v27 = vpop.f32.mrb[4].mxu0  ;;  %v2985_v28 = vpop.f32.mrb[4].mxu1 }
 0x336   :  { %v2964_v30 = vpop.f32.mrb[5].mxu0  ;;  %v2986_v31 = vpop.f32.mrb[5].mxu1 }
 0x337   :  { %v2965_v32 = vadd.f32 %v2964_v30, %v2963_v27  ;;  %v2987_v33 = vadd.f32 %v2986_v31, %v2985_v28  ;;  %v2966_v34 = vpop.f32.mrb[6].mxu0  ;;  %v2988_v35 = vpop.f32.mrb[6].mxu1 }
 0x338   :  { %v2967_v36 = vpop.f32.mrb[7].mxu0  ;;  %v2989_v37 = vpop.f32.mrb[7].mxu1 }
 0x339   :  { %v2472_v38 = vadd.f32 %v2965_v32, %v2905_v29 }
 0x33b   :  { %v2512_v39 = vadd.f32 %v2987_v33, %v2472_v38 }
 0x33d   :  { %v2517_v40 = vmax.f32 %v2512_v39, 0.0 }
 0x33f   :  { %v2518_v41 = vpack.c.bf16 %v2517_v40, %v2517_v40 }
 0x341   :  { %3017 = vmatmul.mubr.bf16.vlgmr.msra.gmra.mrb[8].mxu0 %v2518_v41 }
 0x414   :  { %v2624_v42 = vpop.f32.mrb[8].mxu0 }
 0x415   :  { %v2625_v43 = vadd.f32 %v2938_v48, %v2624_v42  ;;  %v3018_v44 = vpop.f32.mrb[9].mxu0 }
 0x416   :  { %v2627_v45 = vpop.f32.mrb[10].mxu0 }
 0x417   :  { %v2630_v46 = vmax.f32 %v2625_v43, 0.0  ;;  %v3019_v47 = vpop.f32.mrb[11].mxu0 }
 0x419   :  { %2631 = vst [vmem:[#allocation10] sm:$0xff] %v2630_v46 }
 0x41a   :  { %3583 = shalt.err (!%p3580_p8)
}
 0x41b   :  { %s3584_s8 = scalar_lea.hbm %s3814_s9, 128 }
 0x41c   :  { %p3585_p9 = scmp.ne.s32.totalorder %s3814_s9, %s3584_s8  ;;  %p3588_p10 = scmp.lt.u32.totalorder %s3584_s8, %s3814_s9 }
 0x41e   :  { %p3590_p11 = pnand %p3588_p10, %p3585_p9 }
 0x420   :  { %3593 = shalt.err (!%p3590_p11)
}
 0x421   :  { %2641 = dma.vmem_to_hbm [thread:$0]  %s2639_s6, 128, %s3814_s9, [#allocation4]  }
 0x422   :  { %3600 = dma.done.wait [#allocation4], 128  }
 0x423   :  { %3601 = vsyncadd [#allocation4], 4294967168 }
 0x424   :  { %2645 = vsyncpa [#allocation3], 1 }
 0x425   :  { %2646 = vsyncpa [#allocation6], 1 }
 0x426   :  { %2647 = vsyncpa [#allocation9], 1 }
 0x427   :  { %2648 = vsyncpa [#allocation4], 1 }

</bundles_post_ra>
